<compile_context>
chip_gen: v5e
topology: v5e:2x2
jax: 0.10.0
libtpu: 0.0.40
codegen_flags: <defaults>
</compile_context>

<pallas_src>
import functools
import math

import jax
import jax.numpy as jnp
from jax.experimental import pallas as pl
from jax.experimental.pallas import tpu as pltpu


# ------------------------------ Pallas kernel ------------------------------

def _decoder_layer_kernel(
    x_ref, m_ref,
    sa_wq, sa_bq, sa_wk, sa_bk, sa_wv, sa_bv, sa_wo, sa_bo,
    ca_wq, ca_bq, ca_wk, ca_bk, ca_wv, ca_bv, ca_wo, ca_bo,
    w1, b1, w2, b2,
    g1, be1, g2, be2, g3, be3,
    out_ref,
    *, nhead, block_b, eps, compute_dtype):
    """One grid step = `block_b` whole batch elements (rows are batch-major)."""
    cd = compute_dtype
    bb = block_b
    D = x_ref.shape[1]
    T = x_ref.shape[0] // bb
    S = m_ref.shape[0] // bb
    hd = D // nhead

    x = x_ref[...].astype(jnp.float32)     # (bb*T, D)  batch-major rows
    mem = m_ref[...].astype(jnp.float32)   # (bb*S, D)

    def dense(a_f32, w_ref, b_ref):
        # bf16 (or f32) MXU operands, f32 accumulation; bias add in f32.
        # Duplicate converts of the same activation are CSE'd by the compiler.
        return (jnp.dot(a_f32.astype(cd), w_ref[...].astype(cd),
                        preferred_element_type=jnp.float32) + b_ref[...])

    def split_heads(t, L):
        # (bb*L, D) -> (nhead*bb, L, hd); head h lives in lanes [h*hd,(h+1)*hd).
        t3 = t.reshape(bb, L, D)
        th = jnp.stack([t3[..., h * hd:(h + 1) * hd] for h in range(nhead)], axis=0)
        return th.reshape(nhead * bb, L, hd)

    def merge_heads(a, L):
        # (nhead*bb, L, hd) -> (bb*L, D) via one lane concat of nhead pieces.
        a4 = a.reshape(nhead, bb, L, hd)
        cat = jnp.concatenate([a4[h] for h in range(nhead)], axis=-1)   # (bb, L, D)
        return cat.reshape(bb * L, D)

    def attention(q, k, v, wo_ref, bo_ref, lq, lk):
        # q already carries the 1/sqrt(hd) scale (folded into Wq host-side).
        qh = split_heads(q, lq).astype(cd)
        kh = split_heads(k, lk).astype(cd)
        vh = split_heads(v, lk).astype(cd)
        # ONE batched score einsum + ONE batched PV einsum over (head, batch).
        s = jnp.einsum('bqd,bkd->bqk', qh, kh, preferred_element_type=jnp.float32)
        s = s - jnp.max(s, axis=-1, keepdims=True)
        p = jnp.exp(s)
        p = p * pl.reciprocal(jnp.sum(p, axis=-1, keepdims=True), approx=True)
        a = jnp.einsum('bqk,bkd->bqd', p.astype(cd), vh,
                       preferred_element_type=jnp.float32)
        # ONE (rows, D) @ (D, D) output projection.
        return dense(merge_heads(a, lq), wo_ref, bo_ref)

    def layer_norm(t, g_ref, b_ref):
        mu = jnp.mean(t, axis=-1, keepdims=True)
        tc = t - mu
        var = jnp.mean(tc * tc, axis=-1, keepdims=True)
        return tc * jax.lax.rsqrt(var + eps) * g_ref[...] + b_ref[...]

    # ---- self-attention + residual + norm1 (post-norm) ----
    sa = attention(dense(x, sa_wq, sa_bq), dense(x, sa_wk, sa_bk),
                   dense(x, sa_wv, sa_bv), sa_wo, sa_bo, T, T)
    x = layer_norm(x + sa, g1, be1)

    # ---- cross-attention + residual + norm2 ----
    ca = attention(dense(x, ca_wq, ca_bq), dense(mem, ca_wk, ca_bk),
                   dense(mem, ca_wv, ca_bv), ca_wo, ca_bo, T, S)
    x = layer_norm(x + ca, g2, be2)

    # ---- feed-forward + residual + norm3 ----
    hid = jnp.maximum(dense(x, w1, b1), 0.0)          # relu (f32)
    x = layer_norm(x + dense(hid, w2, b2), g3, be3)

    out_ref[...] = x.astype(out_ref.dtype)            # lane-dense full-block store


# ----------------------- host-side weight preparation -----------------------

_WEIGHT_ORDER = (
    "sa_wq", "sa_bq", "sa_wk", "sa_bk", "sa_wv", "sa_bv", "sa_wo", "sa_bo",
    "ca_wq", "ca_bq", "ca_wk", "ca_bk", "ca_wv", "ca_bv", "ca_wo", "ca_bo",
    "w1", "b1", "w2", "b2",
    "g1", "be1", "g2", "be2", "g3", "be3",
)


def prepare_params(params, *, nhead, weight_dtype=jnp.bfloat16):
    """One-time prep: split packed in_proj, pre-transpose all matmul weights,
    fold 1/sqrt(head_dim) into Wq/bq, cast matmul weights to `weight_dtype`
    (biases / layernorm params stay f32)."""
    d = params["sa_out_w"].shape[0]
    scale = 1.0 / math.sqrt(d // nhead)
    f32 = jnp.float32

    def split_in(w, b):
        return ((w[:d], w[d:2 * d], w[2 * d:]),
                (b[0, :d], b[0, d:2 * d], b[0, 2 * d:]))

    (swq, swk, swv), (sbq, sbk, sbv) = split_in(params["sa_in_w"], params["sa_in_b"])
    (cwq, cwk, cwv), (cbq, cbk, cbv) = split_in(params["ca_in_w"], params["ca_in_b"])

    def t(w):
        return w.T.astype(weight_dtype)

    return {
        "sa_wq": (swq.T * scale).astype(weight_dtype),
        "sa_bq": (sbq * scale)[None, :].astype(f32),
        "sa_wk": t(swk), "sa_bk": sbk[None, :].astype(f32),
        "sa_wv": t(swv), "sa_bv": sbv[None, :].astype(f32),
        "sa_wo": t(params["sa_out_w"]), "sa_bo": params["sa_out_b"].astype(f32),
        "ca_wq": (cwq.T * scale).astype(weight_dtype),
        "ca_bq": (cbq * scale)[None, :].astype(f32),
        "ca_wk": t(cwk), "ca_bk": cbk[None, :].astype(f32),
        "ca_wv": t(cwv), "ca_bv": cbv[None, :].astype(f32),
        "ca_wo": t(params["ca_out_w"]), "ca_bo": params["ca_out_b"].astype(f32),
        "w1": t(params["w1"]), "b1": params["b1"].astype(f32),
        "w2": t(params["w2"]), "b2": params["b2"].astype(f32),
        "g1": params["g1"].astype(f32), "be1": params["be1"].astype(f32),
        "g2": params["g2"].astype(f32), "be2": params["be2"].astype(f32),
        "g3": params["g3"].astype(f32), "be3": params["be3"].astype(f32),
    }


# --------------------------------- wrapper ---------------------------------

def transformer_decoder_layer(tgt, memory, prepared, *, nhead, eps=1e-5,
                              compute_dtype=jnp.bfloat16, batch_block=None):
    """tgt: (T, B, D) seq-first (PyTorch default); memory: (S, B, D) -> (T, B, D)."""
    T, B, D = tgt.shape
    S = memory.shape[0]
    assert memory.shape[1] == B and memory.shape[2] == D
    assert D % nhead == 0

    if batch_block is None:
        # Target ~256-512 rows per grid step; must divide B (self-attention
        # requires M-tile boundaries to coincide with batch boundaries).
        batch_block = max(1, min(B, 256 // max(T, 1)))
        while B % batch_block:
            batch_block -= 1
    bb = batch_block
    assert B % bb == 0
    grid = (B // bb,)

    # Layout transform lives in the wrapper: seq-first (T,B,D) -> batch-major
    # (B*T, D) rows with ONE HBM-level XLA transpose (lane-dense kernel I/O).
    x2d = jnp.transpose(tgt, (1, 0, 2)).reshape(B * T, D)
    m2d = jnp.transpose(memory, (1, 0, 2)).reshape(B * S, D)

    weights = [prepared[k] for k in _WEIGHT_ORDER]
    kernel = functools.partial(_decoder_layer_kernel, nhead=nhead, block_b=bb,
                               eps=eps, compute_dtype=compute_dtype)

    def _resident(w):   # full-array block, same block every step -> stays in VMEM
        return pl.BlockSpec(w.shape, lambda i: (0, 0))

    out2d = pl.pallas_call(
        kernel,
        grid=grid,
        in_specs=[pl.BlockSpec((bb * T, D), lambda i: (i, 0)),
                  pl.BlockSpec((bb * S, D), lambda i: (i, 0))]
                 + [_resident(w) for w in weights],
        out_specs=pl.BlockSpec((bb * T, D), lambda i: (i, 0)),
        out_shape=jax.ShapeDtypeStruct((B * T, D), tgt.dtype),
        compiler_params=pltpu.CompilerParams(
            dimension_semantics=("parallel",),
            # Explicit VMEM budget (tune <= physical: 128 MiB v5e/v6e, 64 MiB v7x).
            vmem_limit_bytes=64 * 1024 * 1024,
        ),
    )(x2d, m2d, *weights)

    # batch-major (B*T, D) -> seq-first (T, B, D)
    return out2d.reshape(B, T, D).transpose(1, 0, 2)


# ------------------------- pure-JAX reference check -------------------------

def _reference(tgt, memory, params, *, nhead, eps=1e-5):
    def ln(x, g, b):
        mu = jnp.mean(x, -1, keepdims=True)
        var = jnp.mean((x - mu) ** 2, -1, keepdims=True)
        return (x - mu) / jnp.sqrt(var + eps) * g + b

    def mha(q_in, kv_in, in_w, in_b, out_w, out_b):
        d = q_in.shape[-1]
        hd = d // nhead
        q = q_in @ in_w[0:d].T + in_b[0, 0:d]
        k = kv_in @ in_w[d:2 * d].T + in_b[0, d:2 * d]
        v = kv_in @ in_w[2 * d:3 * d].T + in_b[0, 2 * d:3 * d]
        outs = []
        for h in range(nhead):
            qh, kh, vh = (a[..., h * hd:(h + 1) * hd] for a in (q, k, v))
            s = jnp.einsum("tbd,sbd->bts", qh, kh) / math.sqrt(hd)
            p = jax.nn.softmax(s, axis=-1)
            outs.append(jnp.einsum("bts,sbd->tbd", p, vh))
        o = jnp.concatenate(outs, -1)
        return o @ out_w.T + out_b[0]

    p = params
    x = tgt
    x = ln(x + mha(x, x, p["sa_in_w"], p["sa_in_b"], p["sa_out_w"], p["sa_out_b"]),
           p["g1"][0], p["be1"][0])
    x = ln(x + mha(x, memory, p["ca_in_w"], p["ca_in_b"], p["ca_out_w"], p["ca_out_b"]),
           p["g2"][0], p["be2"][0])
    ff = jnp.maximum(x @ p["w1"].T + p["b1"][0], 0.0) @ p["w2"].T + p["b2"][0]
    x = ln(x + ff, p["g3"][0], p["be3"][0])
    return x


# ----------------------------------- main -----------------------------------

if __name__ == "__main__":
    # Small shapes consistent with the module: seq-first (T, B, D).
    T, S, B = 8, 8, 2
    D, NHEAD, FF = 32, 4, 64

    keys = jax.random.split(jax.random.PRNGKey(0), 14)

    def init(k, shape, scale=0.05):
        return jax.random.normal(k, shape, jnp.float32) * scale

    params = {
        "sa_in_w": init(keys[0], (3 * D, D)),
        "sa_in_b": init(keys[1], (1, 3 * D)),
        "sa_out_w": init(keys[2], (D, D)),
        "sa_out_b": init(keys[3], (1, D)),
        "ca_in_w": init(keys[4], (3 * D, D)),
        "ca_in_b": init(keys[5], (1, 3 * D)),
        "ca_out_w": init(keys[6], (D, D)),
        "ca_out_b": init(keys[7], (1, D)),
        "w1": init(keys[8], (FF, D)),
        "b1": init(keys[9], (1, FF)),
        "w2": init(keys[10], (D, FF)),
        "b2": init(keys[11], (1, D)),
        "g1": jnp.ones((1, D), jnp.float32), "be1": jnp.zeros((1, D), jnp.float32),
        "g2": jnp.ones((1, D), jnp.float32), "be2": jnp.zeros((1, D), jnp.float32),
        "g3": jnp.ones((1, D), jnp.float32), "be3": jnp.zeros((1, D), jnp.float32),
    }

    tgt = jax.random.normal(keys[12], (T, B, D), jnp.float32)
    memory = jax.random.normal(keys[13], (S, B, D), jnp.float32)

    ref = _reference(tgt, memory, params, nhead=NHEAD, eps=1e-5)

    # 1) bf16-MXU path (production config), explicit batch_block=1 -> grid=(B,).
    prepared_bf16 = prepare_params(params, nhead=NHEAD, weight_dtype=jnp.bfloat16)
    out_bf16 = transformer_decoder_layer(tgt, memory, prepared_bf16, nhead=NHEAD,
                                         eps=1e-5, compute_dtype=jnp.bfloat16,
                                         batch_block=1)
    out_bf16 = jax.block_until_ready(out_bf16)
    assert out_bf16.shape == (T, B, D)
    assert jnp.max(jnp.abs(out_bf16 - ref)) < 3e-2, "bf16 kernel mismatch vs. reference"

    # 2) f32-MXU verification path (tight tolerance), default batch_block heuristic.
    prepared_f32 = prepare_params(params, nhead=NHEAD, weight_dtype=jnp.float32)
    out_f32 = transformer_decoder_layer(tgt, memory, prepared_f32, nhead=NHEAD,
                                        eps=1e-5, compute_dtype=jnp.float32)
    out_f32 = jax.block_until_ready(out_f32)
    assert out_f32.shape == (T, B, D)
    assert jnp.max(jnp.abs(out_f32 - ref)) < 5e-3, "f32 kernel mismatch vs. reference"

    print("KERNEL_OK")
</pallas_src>

<mosaic_0001>
module attributes {stable_mosaic.version = 11 : i64} {
  func.func @_decoder_layer_kernel(%arg0: i32, %arg1: memref<8x32xf32, #tpu.memory_space<vmem>>, %arg2: memref<8x32xf32, #tpu.memory_space<vmem>>, %arg3: memref<32x32xbf16, #tpu.memory_space<vmem>>, %arg4: memref<1x32xf32, #tpu.memory_space<vmem>>, %arg5: memref<32x32xbf16, #tpu.memory_space<vmem>>, %arg6: memref<1x32xf32, #tpu.memory_space<vmem>>, %arg7: memref<32x32xbf16, #tpu.memory_space<vmem>>, %arg8: memref<1x32xf32, #tpu.memory_space<vmem>>, %arg9: memref<32x32xbf16, #tpu.memory_space<vmem>>, %arg10: memref<1x32xf32, #tpu.memory_space<vmem>>, %arg11: memref<32x32xbf16, #tpu.memory_space<vmem>>, %arg12: memref<1x32xf32, #tpu.memory_space<vmem>>, %arg13: memref<32x32xbf16, #tpu.memory_space<vmem>>, %arg14: memref<1x32xf32, #tpu.memory_space<vmem>>, %arg15: memref<32x32xbf16, #tpu.memory_space<vmem>>, %arg16: memref<1x32xf32, #tpu.memory_space<vmem>>, %arg17: memref<32x32xbf16, #tpu.memory_space<vmem>>, %arg18: memref<1x32xf32, #tpu.memory_space<vmem>>, %arg19: memref<32x64xbf16, #tpu.memory_space<vmem>>, %arg20: memref<1x64xf32, #tpu.memory_space<vmem>>, %arg21: memref<64x32xbf16, #tpu.memory_space<vmem>>, %arg22: memref<1x32xf32, #tpu.memory_space<vmem>>, %arg23: memref<1x32xf32, #tpu.memory_space<vmem>>, %arg24: memref<1x32xf32, #tpu.memory_space<vmem>>, %arg25: memref<1x32xf32, #tpu.memory_space<vmem>>, %arg26: memref<1x32xf32, #tpu.memory_space<vmem>>, %arg27: memref<1x32xf32, #tpu.memory_space<vmem>>, %arg28: memref<1x32xf32, #tpu.memory_space<vmem>>, %arg29: memref<8x32xf32, #tpu.memory_space<vmem>>) attributes {dimension_semantics = [#tpu.dimension_semantics<parallel>], iteration_bounds = array<i64: 2>, scalar_prefetch = 0 : i64, scratch_operands = 0 : i64, tpu.core_type = #tpu.core_type<tc>, window_params = [{transform_indices = @transform_0, window_bounds = array<i64: 8, 32>}, {transform_indices = @transform_1, window_bounds = array<i64: 8, 32>}, {pipeline_mode = #tpu.pipeline_mode<synchronous>, transform_indices = @transform_2, window_bounds = array<i64: 32, 32>}, {pipeline_mode = #tpu.pipeline_mode<synchronous>, transform_indices = @transform_3, window_bounds = array<i64: 1, 32>}, {pipeline_mode = #tpu.pipeline_mode<synchronous>, transform_indices = @transform_4, window_bounds = array<i64: 32, 32>}, {pipeline_mode = #tpu.pipeline_mode<synchronous>, transform_indices = @transform_5, window_bounds = array<i64: 1, 32>}, {pipeline_mode = #tpu.pipeline_mode<synchronous>, transform_indices = @transform_6, window_bounds = array<i64: 32, 32>}, {pipeline_mode = #tpu.pipeline_mode<synchronous>, transform_indices = @transform_7, window_bounds = array<i64: 1, 32>}, {pipeline_mode = #tpu.pipeline_mode<synchronous>, transform_indices = @transform_8, window_bounds = array<i64: 32, 32>}, {pipeline_mode = #tpu.pipeline_mode<synchronous>, transform_indices = @transform_9, window_bounds = array<i64: 1, 32>}, {pipeline_mode = #tpu.pipeline_mode<synchronous>, transform_indices = @transform_10, window_bounds = array<i64: 32, 32>}, {pipeline_mode = #tpu.pipeline_mode<synchronous>, transform_indices = @transform_11, window_bounds = array<i64: 1, 32>}, {pipeline_mode = #tpu.pipeline_mode<synchronous>, transform_indices = @transform_12, window_bounds = array<i64: 32, 32>}, {pipeline_mode = #tpu.pipeline_mode<synchronous>, transform_indices = @transform_13, window_bounds = array<i64: 1, 32>}, {pipeline_mode = #tpu.pipeline_mode<synchronous>, transform_indices = @transform_14, window_bounds = array<i64: 32, 32>}, {pipeline_mode = #tpu.pipeline_mode<synchronous>, transform_indices = @transform_15, window_bounds = array<i64: 1, 32>}, {pipeline_mode = #tpu.pipeline_mode<synchronous>, transform_indices = @transform_16, window_bounds = array<i64: 32, 32>}, {pipeline_mode = #tpu.pipeline_mode<synchronous>, transform_indices = @transform_17, window_bounds = array<i64: 1, 32>}, {pipeline_mode = #tpu.pipeline_mode<synchronous>, transform_indices = @transform_18, window_bounds = array<i64: 32, 64>}, {pipeline_mode = #tpu.pipeline_mode<synchronous>, transform_indices = @transform_19, window_bounds = array<i64: 1, 64>}, {pipeline_mode = #tpu.pipeline_mode<synchronous>, transform_indices = @transform_20, window_bounds = array<i64: 64, 32>}, {pipeline_mode = #tpu.pipeline_mode<synchronous>, transform_indices = @transform_21, window_bounds = array<i64: 1, 32>}, {pipeline_mode = #tpu.pipeline_mode<synchronous>, transform_indices = @transform_22, window_bounds = array<i64: 1, 32>}, {pipeline_mode = #tpu.pipeline_mode<synchronous>, transform_indices = @transform_23, window_bounds = array<i64: 1, 32>}, {pipeline_mode = #tpu.pipeline_mode<synchronous>, transform_indices = @transform_24, window_bounds = array<i64: 1, 32>}, {pipeline_mode = #tpu.pipeline_mode<synchronous>, transform_indices = @transform_25, window_bounds = array<i64: 1, 32>}, {pipeline_mode = #tpu.pipeline_mode<synchronous>, transform_indices = @transform_26, window_bounds = array<i64: 1, 32>}, {pipeline_mode = #tpu.pipeline_mode<synchronous>, transform_indices = @transform_27, window_bounds = array<i64: 1, 32>}, {transform_indices = @transform_28, window_bounds = array<i64: 8, 32>}]} {
    %c0 = arith.constant 0 : index
    %c0_0 = arith.constant 0 : index
    %0 = vector.load %arg1[%c0, %c0_0] : memref<8x32xf32, #tpu.memory_space<vmem>>, vector<8x32xf32>
    %c0_1 = arith.constant 0 : index
    %c0_2 = arith.constant 0 : index
    %1 = vector.load %arg2[%c0_1, %c0_2] : memref<8x32xf32, #tpu.memory_space<vmem>>, vector<8x32xf32>
    %2 = arith.truncf %0 : vector<8x32xf32> to vector<8x32xbf16>
    %c0_3 = arith.constant 0 : index
    %c0_4 = arith.constant 0 : index
    %3 = vector.load %arg3[%c0_3, %c0_4] : memref<32x32xbf16, #tpu.memory_space<vmem>>, vector<32x32xbf16>
    %cst = arith.constant dense<0.000000e+00> : vector<8x32xf32>
    %4 = tpu.matmul %2, %3, %cst {dimension_numbers = #tpu.dot_dimension_numbers<[1], [0], [0], [1], [0, 0, 1, 1], [], []>} : vector<8x32xbf16>, vector<32x32xbf16>, vector<8x32xf32> -> vector<8x32xf32>
    %c0_5 = arith.constant 0 : index
    %c0_6 = arith.constant 0 : index
    %5 = vector.load %arg4[%c0_5, %c0_6] : memref<1x32xf32, #tpu.memory_space<vmem>>, vector<1x32xf32>
    %6 = vector.broadcast %5 : vector<1x32xf32> to vector<8x32xf32>
    %7 = arith.addf %4, %6 : vector<8x32xf32>
    %8 = arith.truncf %0 : vector<8x32xf32> to vector<8x32xbf16>
    %c0_7 = arith.constant 0 : index
    %c0_8 = arith.constant 0 : index
    %9 = vector.load %arg5[%c0_7, %c0_8] : memref<32x32xbf16, #tpu.memory_space<vmem>>, vector<32x32xbf16>
    %cst_9 = arith.constant dense<0.000000e+00> : vector<8x32xf32>
    %10 = tpu.matmul %8, %9, %cst_9 {dimension_numbers = #tpu.dot_dimension_numbers<[1], [0], [0], [1], [0, 0, 1, 1], [], []>} : vector<8x32xbf16>, vector<32x32xbf16>, vector<8x32xf32> -> vector<8x32xf32>
    %c0_10 = arith.constant 0 : index
    %c0_11 = arith.constant 0 : index
    %11 = vector.load %arg6[%c0_10, %c0_11] : memref<1x32xf32, #tpu.memory_space<vmem>>, vector<1x32xf32>
    %12 = vector.broadcast %11 : vector<1x32xf32> to vector<8x32xf32>
    %13 = arith.addf %10, %12 : vector<8x32xf32>
    %14 = arith.truncf %0 : vector<8x32xf32> to vector<8x32xbf16>
    %c0_12 = arith.constant 0 : index
    %c0_13 = arith.constant 0 : index
    %15 = vector.load %arg7[%c0_12, %c0_13] : memref<32x32xbf16, #tpu.memory_space<vmem>>, vector<32x32xbf16>
    %cst_14 = arith.constant dense<0.000000e+00> : vector<8x32xf32>
    %16 = tpu.matmul %14, %15, %cst_14 {dimension_numbers = #tpu.dot_dimension_numbers<[1], [0], [0], [1], [0, 0, 1, 1], [], []>} : vector<8x32xbf16>, vector<32x32xbf16>, vector<8x32xf32> -> vector<8x32xf32>
    %c0_15 = arith.constant 0 : index
    %c0_16 = arith.constant 0 : index
    %17 = vector.load %arg8[%c0_15, %c0_16] : memref<1x32xf32, #tpu.memory_space<vmem>>, vector<1x32xf32>
    %18 = vector.broadcast %17 : vector<1x32xf32> to vector<8x32xf32>
    %19 = arith.addf %16, %18 : vector<8x32xf32>
    %20 = vector.shape_cast %7 : vector<8x32xf32> to vector<1x8x32xf32>
    %21 = vector.extract_strided_slice %20 {offsets = [0, 0, 0], sizes = [1, 8, 8], strides = [1, 1, 1]} : vector<1x8x32xf32> to vector<1x8x8xf32>
    %22 = vector.extract_strided_slice %20 {offsets = [0, 0, 8], sizes = [1, 8, 8], strides = [1, 1, 1]} : vector<1x8x32xf32> to vector<1x8x8xf32>
    %23 = vector.extract_strided_slice %20 {offsets = [0, 0, 16], sizes = [1, 8, 8], strides = [1, 1, 1]} : vector<1x8x32xf32> to vector<1x8x8xf32>
    %24 = vector.extract_strided_slice %20 {offsets = [0, 0, 24], sizes = [1, 8, 8], strides = [1, 1, 1]} : vector<1x8x32xf32> to vector<1x8x8xf32>
    %25 = vector.shape_cast %21 : vector<1x8x8xf32> to vector<1x1x8x8xf32>
    %26 = vector.shape_cast %22 : vector<1x8x8xf32> to vector<1x1x8x8xf32>
    %27 = vector.shape_cast %23 : vector<1x8x8xf32> to vector<1x1x8x8xf32>
    %28 = vector.shape_cast %24 : vector<1x8x8xf32> to vector<1x1x8x8xf32>
    %29 = tpu.concatenate %25, %26, %27, %28 in 0 : vector<1x1x8x8xf32>, vector<1x1x8x8xf32>, vector<1x1x8x8xf32>, vector<1x1x8x8xf32> -> vector<4x1x8x8xf32>
    %30 = vector.shape_cast %29 : vector<4x1x8x8xf32> to vector<4x8x8xf32>
    %31 = arith.truncf %30 : vector<4x8x8xf32> to vector<4x8x8xbf16>
    %32 = vector.shape_cast %13 : vector<8x32xf32> to vector<1x8x32xf32>
    %33 = vector.extract_strided_slice %32 {offsets = [0, 0, 0], sizes = [1, 8, 8], strides = [1, 1, 1]} : vector<1x8x32xf32> to vector<1x8x8xf32>
    %34 = vector.extract_strided_slice %32 {offsets = [0, 0, 8], sizes = [1, 8, 8], strides = [1, 1, 1]} : vector<1x8x32xf32> to vector<1x8x8xf32>
    %35 = vector.extract_strided_slice %32 {offsets = [0, 0, 16], sizes = [1, 8, 8], strides = [1, 1, 1]} : vector<1x8x32xf32> to vector<1x8x8xf32>
    %36 = vector.extract_strided_slice %32 {offsets = [0, 0, 24], sizes = [1, 8, 8], strides = [1, 1, 1]} : vector<1x8x32xf32> to vector<1x8x8xf32>
    %37 = vector.shape_cast %33 : vector<1x8x8xf32> to vector<1x1x8x8xf32>
    %38 = vector.shape_cast %34 : vector<1x8x8xf32> to vector<1x1x8x8xf32>
    %39 = vector.shape_cast %35 : vector<1x8x8xf32> to vector<1x1x8x8xf32>
    %40 = vector.shape_cast %36 : vector<1x8x8xf32> to vector<1x1x8x8xf32>
    %41 = tpu.concatenate %37, %38, %39, %40 in 0 : vector<1x1x8x8xf32>, vector<1x1x8x8xf32>, vector<1x1x8x8xf32>, vector<1x1x8x8xf32> -> vector<4x1x8x8xf32>
    %42 = vector.shape_cast %41 : vector<4x1x8x8xf32> to vector<4x8x8xf32>
    %43 = arith.truncf %42 : vector<4x8x8xf32> to vector<4x8x8xbf16>
    %44 = vector.shape_cast %19 : vector<8x32xf32> to vector<1x8x32xf32>
    %45 = vector.extract_strided_slice %44 {offsets = [0, 0, 0], sizes = [1, 8, 8], strides = [1, 1, 1]} : vector<1x8x32xf32> to vector<1x8x8xf32>
    %46 = vector.extract_strided_slice %44 {offsets = [0, 0, 8], sizes = [1, 8, 8], strides = [1, 1, 1]} : vector<1x8x32xf32> to vector<1x8x8xf32>
    %47 = vector.extract_strided_slice %44 {offsets = [0, 0, 16], sizes = [1, 8, 8], strides = [1, 1, 1]} : vector<1x8x32xf32> to vector<1x8x8xf32>
    %48 = vector.extract_strided_slice %44 {offsets = [0, 0, 24], sizes = [1, 8, 8], strides = [1, 1, 1]} : vector<1x8x32xf32> to vector<1x8x8xf32>
    %49 = vector.shape_cast %45 : vector<1x8x8xf32> to vector<1x1x8x8xf32>
    %50 = vector.shape_cast %46 : vector<1x8x8xf32> to vector<1x1x8x8xf32>
    %51 = vector.shape_cast %47 : vector<1x8x8xf32> to vector<1x1x8x8xf32>
    %52 = vector.shape_cast %48 : vector<1x8x8xf32> to vector<1x1x8x8xf32>
    %53 = tpu.concatenate %49, %50, %51, %52 in 0 : vector<1x1x8x8xf32>, vector<1x1x8x8xf32>, vector<1x1x8x8xf32>, vector<1x1x8x8xf32> -> vector<4x1x8x8xf32>
    %54 = vector.shape_cast %53 : vector<4x1x8x8xf32> to vector<4x8x8xf32>
    %55 = arith.truncf %54 : vector<4x8x8xf32> to vector<4x8x8xbf16>
    "tpu.trace_start"() <{level = 10 : i32, message = "bqd,bkd->bqk"}> : () -> ()
    %cst_17 = arith.constant dense<0.000000e+00> : vector<4x8x8xf32>
    %56 = tpu.matmul %31, %43, %cst_17 {dimension_numbers = #tpu.dot_dimension_numbers<[2], [2], [1], [1], [0, 0, 0, 1, 1, 1], [0], [0]>} : vector<4x8x8xbf16>, vector<4x8x8xbf16>, vector<4x8x8xf32> -> vector<4x8x8xf32>
    "tpu.trace_stop"() : () -> ()
    %cst_18 = arith.constant dense<0xFF800000> : vector<4x8xf32>
    %57 = vector.multi_reduction <maximumf>, %56, %cst_18 [2] : vector<4x8x8xf32> to vector<4x8xf32>
    %58 = vector.shape_cast %57 : vector<4x8xf32> to vector<4x8x1xf32>
    %59 = vector.broadcast %58 : vector<4x8x1xf32> to vector<4x8x8xf32>
    %60 = arith.subf %56, %59 : vector<4x8x8xf32>
    %61 = math.exp %60 : vector<4x8x8xf32>
    %cst_19 = arith.constant dense<0.000000e+00> : vector<4x8xf32>
    %62 = vector.multi_reduction <add>, %61, %cst_19 [2] : vector<4x8x8xf32> to vector<4x8xf32>
    %63 = vector.shape_cast %62 : vector<4x8xf32> to vector<4x8x1xf32>
    %64 = tpu.reciprocal %63 {approx = true} : vector<4x8x1xf32> -> vector<4x8x1xf32>
    %65 = vector.broadcast %64 : vector<4x8x1xf32> to vector<4x8x8xf32>
    %66 = arith.mulf %61, %65 : vector<4x8x8xf32>
    %67 = arith.truncf %66 : vector<4x8x8xf32> to vector<4x8x8xbf16>
    "tpu.trace_start"() <{level = 10 : i32, message = "bqk,bkd->bqd"}> : () -> ()
    %cst_20 = arith.constant dense<0.000000e+00> : vector<4x8x8xf32>
    %68 = tpu.matmul %67, %55, %cst_20 {dimension_numbers = #tpu.dot_dimension_numbers<[2], [1], [1], [2], [0, 0, 0, 1, 1, 2], [0], [0]>} : vector<4x8x8xbf16>, vector<4x8x8xbf16>, vector<4x8x8xf32> -> vector<4x8x8xf32>
    "tpu.trace_stop"() : () -> ()
    %69 = vector.shape_cast %68 : vector<4x8x8xf32> to vector<4x1x8x8xf32>
    %70 = vector.extract_strided_slice %69 {offsets = [0, 0, 0, 0], sizes = [1, 1, 8, 8], strides = [1, 1, 1, 1]} : vector<4x1x8x8xf32> to vector<1x1x8x8xf32>
    %71 = vector.shape_cast %70 : vector<1x1x8x8xf32> to vector<1x8x8xf32>
    %72 = vector.extract_strided_slice %69 {offsets = [1, 0, 0, 0], sizes = [1, 1, 8, 8], strides = [1, 1, 1, 1]} : vector<4x1x8x8xf32> to vector<1x1x8x8xf32>
    %73 = vector.shape_cast %72 : vector<1x1x8x8xf32> to vector<1x8x8xf32>
    %74 = vector.extract_strided_slice %69 {offsets = [2, 0, 0, 0], sizes = [1, 1, 8, 8], strides = [1, 1, 1, 1]} : vector<4x1x8x8xf32> to vector<1x1x8x8xf32>
    %75 = vector.shape_cast %74 : vector<1x1x8x8xf32> to vector<1x8x8xf32>
    %76 = vector.extract_strided_slice %69 {offsets = [3, 0, 0, 0], sizes = [1, 1, 8, 8], strides = [1, 1, 1, 1]} : vector<4x1x8x8xf32> to vector<1x1x8x8xf32>
    %77 = vector.shape_cast %76 : vector<1x1x8x8xf32> to vector<1x8x8xf32>
    %78 = tpu.concatenate %71, %73, %75, %77 in 2 : vector<1x8x8xf32>, vector<1x8x8xf32>, vector<1x8x8xf32>, vector<1x8x8xf32> -> vector<1x8x32xf32>
    %79 = vector.shape_cast %78 : vector<1x8x32xf32> to vector<8x32xf32>
    %80 = arith.truncf %79 : vector<8x32xf32> to vector<8x32xbf16>
    %c0_21 = arith.constant 0 : index
    %c0_22 = arith.constant 0 : index
    %81 = vector.load %arg9[%c0_21, %c0_22] : memref<32x32xbf16, #tpu.memory_space<vmem>>, vector<32x32xbf16>
    %cst_23 = arith.constant dense<0.000000e+00> : vector<8x32xf32>
    %82 = tpu.matmul %80, %81, %cst_23 {dimension_numbers = #tpu.dot_dimension_numbers<[1], [0], [0], [1], [0, 0, 1, 1], [], []>} : vector<8x32xbf16>, vector<32x32xbf16>, vector<8x32xf32> -> vector<8x32xf32>
    %c0_24 = arith.constant 0 : index
    %c0_25 = arith.constant 0 : index
    %83 = vector.load %arg10[%c0_24, %c0_25] : memref<1x32xf32, #tpu.memory_space<vmem>>, vector<1x32xf32>
    %84 = vector.broadcast %83 : vector<1x32xf32> to vector<8x32xf32>
    %85 = arith.addf %82, %84 : vector<8x32xf32>
    %86 = arith.addf %0, %85 : vector<8x32xf32>
    %cst_26 = arith.constant dense<0.000000e+00> : vector<8xf32>
    %87 = vector.multi_reduction <add>, %86, %cst_26 [1] : vector<8x32xf32> to vector<8xf32>
    %88 = vector.shape_cast %87 : vector<8xf32> to vector<8x1xf32>
    %cst_27 = arith.constant 3.200000e+01 : f32
    %89 = vector.broadcast %cst_27 : f32 to vector<8x1xf32>
    %90 = arith.divf %88, %89 : vector<8x1xf32>
    %91 = vector.broadcast %90 : vector<8x1xf32> to vector<8x32xf32>
    %92 = arith.subf %86, %91 : vector<8x32xf32>
    %93 = arith.mulf %92, %92 : vector<8x32xf32>
    %cst_28 = arith.constant dense<0.000000e+00> : vector<8xf32>
    %94 = vector.multi_reduction <add>, %93, %cst_28 [1] : vector<8x32xf32> to vector<8xf32>
    %95 = vector.shape_cast %94 : vector<8xf32> to vector<8x1xf32>
    %cst_29 = arith.constant 3.200000e+01 : f32
    %96 = vector.broadcast %cst_29 : f32 to vector<8x1xf32>
    %97 = arith.divf %95, %96 : vector<8x1xf32>
    %cst_30 = arith.constant 9.99999974E-6 : f32
    %98 = vector.broadcast %cst_30 : f32 to vector<8x1xf32>
    %99 = arith.addf %97, %98 : vector<8x1xf32>
    %100 = math.rsqrt %99 : vector<8x1xf32>
    %101 = vector.broadcast %100 : vector<8x1xf32> to vector<8x32xf32>
    %102 = arith.mulf %92, %101 : vector<8x32xf32>
    %c0_31 = arith.constant 0 : index
    %c0_32 = arith.constant 0 : index
    %103 = vector.load %arg23[%c0_31, %c0_32] : memref<1x32xf32, #tpu.memory_space<vmem>>, vector<1x32xf32>
    %104 = vector.broadcast %103 : vector<1x32xf32> to vector<8x32xf32>
    %105 = arith.mulf %102, %104 : vector<8x32xf32>
    %c0_33 = arith.constant 0 : index
    %c0_34 = arith.constant 0 : index
    %106 = vector.load %arg24[%c0_33, %c0_34] : memref<1x32xf32, #tpu.memory_space<vmem>>, vector<1x32xf32>
    %107 = vector.broadcast %106 : vector<1x32xf32> to vector<8x32xf32>
    %108 = arith.addf %105, %107 : vector<8x32xf32>
    %109 = arith.truncf %108 : vector<8x32xf32> to vector<8x32xbf16>
    %c0_35 = arith.constant 0 : index
    %c0_36 = arith.constant 0 : index
    %110 = vector.load %arg11[%c0_35, %c0_36] : memref<32x32xbf16, #tpu.memory_space<vmem>>, vector<32x32xbf16>
    %cst_37 = arith.constant dense<0.000000e+00> : vector<8x32xf32>
    %111 = tpu.matmul %109, %110, %cst_37 {dimension_numbers = #tpu.dot_dimension_numbers<[1], [0], [0], [1], [0, 0, 1, 1], [], []>} : vector<8x32xbf16>, vector<32x32xbf16>, vector<8x32xf32> -> vector<8x32xf32>
    %c0_38 = arith.constant 0 : index
    %c0_39 = arith.constant 0 : index
    %112 = vector.load %arg12[%c0_38, %c0_39] : memref<1x32xf32, #tpu.memory_space<vmem>>, vector<1x32xf32>
    %113 = vector.broadcast %112 : vector<1x32xf32> to vector<8x32xf32>
    %114 = arith.addf %111, %113 : vector<8x32xf32>
    %115 = arith.truncf %1 : vector<8x32xf32> to vector<8x32xbf16>
    %c0_40 = arith.constant 0 : index
    %c0_41 = arith.constant 0 : index
    %116 = vector.load %arg13[%c0_40, %c0_41] : memref<32x32xbf16, #tpu.memory_space<vmem>>, vector<32x32xbf16>
    %cst_42 = arith.constant dense<0.000000e+00> : vector<8x32xf32>
    %117 = tpu.matmul %115, %116, %cst_42 {dimension_numbers = #tpu.dot_dimension_numbers<[1], [0], [0], [1], [0, 0, 1, 1], [], []>} : vector<8x32xbf16>, vector<32x32xbf16>, vector<8x32xf32> -> vector<8x32xf32>
    %c0_43 = arith.constant 0 : index
    %c0_44 = arith.constant 0 : index
    %118 = vector.load %arg14[%c0_43, %c0_44] : memref<1x32xf32, #tpu.memory_space<vmem>>, vector<1x32xf32>
    %119 = vector.broadcast %118 : vector<1x32xf32> to vector<8x32xf32>
    %120 = arith.addf %117, %119 : vector<8x32xf32>
    %121 = arith.truncf %1 : vector<8x32xf32> to vector<8x32xbf16>
    %c0_45 = arith.constant 0 : index
    %c0_46 = arith.constant 0 : index
    %122 = vector.load %arg15[%c0_45, %c0_46] : memref<32x32xbf16, #tpu.memory_space<vmem>>, vector<32x32xbf16>
    %cst_47 = arith.constant dense<0.000000e+00> : vector<8x32xf32>
    %123 = tpu.matmul %121, %122, %cst_47 {dimension_numbers = #tpu.dot_dimension_numbers<[1], [0], [0], [1], [0, 0, 1, 1], [], []>} : vector<8x32xbf16>, vector<32x32xbf16>, vector<8x32xf32> -> vector<8x32xf32>
    %c0_48 = arith.constant 0 : index
    %c0_49 = arith.constant 0 : index
    %124 = vector.load %arg16[%c0_48, %c0_49] : memref<1x32xf32, #tpu.memory_space<vmem>>, vector<1x32xf32>
    %125 = vector.broadcast %124 : vector<1x32xf32> to vector<8x32xf32>
    %126 = arith.addf %123, %125 : vector<8x32xf32>
    %127 = vector.shape_cast %114 : vector<8x32xf32> to vector<1x8x32xf32>
    %128 = vector.extract_strided_slice %127 {offsets = [0, 0, 0], sizes = [1, 8, 8], strides = [1, 1, 1]} : vector<1x8x32xf32> to vector<1x8x8xf32>
    %129 = vector.extract_strided_slice %127 {offsets = [0, 0, 8], sizes = [1, 8, 8], strides = [1, 1, 1]} : vector<1x8x32xf32> to vector<1x8x8xf32>
    %130 = vector.extract_strided_slice %127 {offsets = [0, 0, 16], sizes = [1, 8, 8], strides = [1, 1, 1]} : vector<1x8x32xf32> to vector<1x8x8xf32>
    %131 = vector.extract_strided_slice %127 {offsets = [0, 0, 24], sizes = [1, 8, 8], strides = [1, 1, 1]} : vector<1x8x32xf32> to vector<1x8x8xf32>
    %132 = vector.shape_cast %128 : vector<1x8x8xf32> to vector<1x1x8x8xf32>
    %133 = vector.shape_cast %129 : vector<1x8x8xf32> to vector<1x1x8x8xf32>
    %134 = vector.shape_cast %130 : vector<1x8x8xf32> to vector<1x1x8x8xf32>
    %135 = vector.shape_cast %131 : vector<1x8x8xf32> to vector<1x1x8x8xf32>
    %136 = tpu.concatenate %132, %133, %134, %135 in 0 : vector<1x1x8x8xf32>, vector<1x1x8x8xf32>, vector<1x1x8x8xf32>, vector<1x1x8x8xf32> -> vector<4x1x8x8xf32>
    %137 = vector.shape_cast %136 : vector<4x1x8x8xf32> to vector<4x8x8xf32>
    %138 = arith.truncf %137 : vector<4x8x8xf32> to vector<4x8x8xbf16>
    %139 = vector.shape_cast %120 : vector<8x32xf32> to vector<1x8x32xf32>
    %140 = vector.extract_strided_slice %139 {offsets = [0, 0, 0], sizes = [1, 8, 8], strides = [1, 1, 1]} : vector<1x8x32xf32> to vector<1x8x8xf32>
    %141 = vector.extract_strided_slice %139 {offsets = [0, 0, 8], sizes = [1, 8, 8], strides = [1, 1, 1]} : vector<1x8x32xf32> to vector<1x8x8xf32>
    %142 = vector.extract_strided_slice %139 {offsets = [0, 0, 16], sizes = [1, 8, 8], strides = [1, 1, 1]} : vector<1x8x32xf32> to vector<1x8x8xf32>
    %143 = vector.extract_strided_slice %139 {offsets = [0, 0, 24], sizes = [1, 8, 8], strides = [1, 1, 1]} : vector<1x8x32xf32> to vector<1x8x8xf32>
    %144 = vector.shape_cast %140 : vector<1x8x8xf32> to vector<1x1x8x8xf32>
    %145 = vector.shape_cast %141 : vector<1x8x8xf32> to vector<1x1x8x8xf32>
    %146 = vector.shape_cast %142 : vector<1x8x8xf32> to vector<1x1x8x8xf32>
    %147 = vector.shape_cast %143 : vector<1x8x8xf32> to vector<1x1x8x8xf32>
    %148 = tpu.concatenate %144, %145, %146, %147 in 0 : vector<1x1x8x8xf32>, vector<1x1x8x8xf32>, vector<1x1x8x8xf32>, vector<1x1x8x8xf32> -> vector<4x1x8x8xf32>
    %149 = vector.shape_cast %148 : vector<4x1x8x8xf32> to vector<4x8x8xf32>
    %150 = arith.truncf %149 : vector<4x8x8xf32> to vector<4x8x8xbf16>
    %151 = vector.shape_cast %126 : vector<8x32xf32> to vector<1x8x32xf32>
    %152 = vector.extract_strided_slice %151 {offsets = [0, 0, 0], sizes = [1, 8, 8], strides = [1, 1, 1]} : vector<1x8x32xf32> to vector<1x8x8xf32>
    %153 = vector.extract_strided_slice %151 {offsets = [0, 0, 8], sizes = [1, 8, 8], strides = [1, 1, 1]} : vector<1x8x32xf32> to vector<1x8x8xf32>
    %154 = vector.extract_strided_slice %151 {offsets = [0, 0, 16], sizes = [1, 8, 8], strides = [1, 1, 1]} : vector<1x8x32xf32> to vector<1x8x8xf32>
    %155 = vector.extract_strided_slice %151 {offsets = [0, 0, 24], sizes = [1, 8, 8], strides = [1, 1, 1]} : vector<1x8x32xf32> to vector<1x8x8xf32>
    %156 = vector.shape_cast %152 : vector<1x8x8xf32> to vector<1x1x8x8xf32>
    %157 = vector.shape_cast %153 : vector<1x8x8xf32> to vector<1x1x8x8xf32>
    %158 = vector.shape_cast %154 : vector<1x8x8xf32> to vector<1x1x8x8xf32>
    %159 = vector.shape_cast %155 : vector<1x8x8xf32> to vector<1x1x8x8xf32>
    %160 = tpu.concatenate %156, %157, %158, %159 in 0 : vector<1x1x8x8xf32>, vector<1x1x8x8xf32>, vector<1x1x8x8xf32>, vector<1x1x8x8xf32> -> vector<4x1x8x8xf32>
    %161 = vector.shape_cast %160 : vector<4x1x8x8xf32> to vector<4x8x8xf32>
    %162 = arith.truncf %161 : vector<4x8x8xf32> to vector<4x8x8xbf16>
    "tpu.trace_start"() <{level = 10 : i32, message = "bqd,bkd->bqk"}> : () -> ()
    %cst_50 = arith.constant dense<0.000000e+00> : vector<4x8x8xf32>
    %163 = tpu.matmul %138, %150, %cst_50 {dimension_numbers = #tpu.dot_dimension_numbers<[2], [2], [1], [1], [0, 0, 0, 1, 1, 1], [0], [0]>} : vector<4x8x8xbf16>, vector<4x8x8xbf16>, vector<4x8x8xf32> -> vector<4x8x8xf32>
    "tpu.trace_stop"() : () -> ()
    %cst_51 = arith.constant dense<0xFF800000> : vector<4x8xf32>
    %164 = vector.multi_reduction <maximumf>, %163, %cst_51 [2] : vector<4x8x8xf32> to vector<4x8xf32>
    %165 = vector.shape_cast %164 : vector<4x8xf32> to vector<4x8x1xf32>
    %166 = vector.broadcast %165 : vector<4x8x1xf32> to vector<4x8x8xf32>
    %167 = arith.subf %163, %166 : vector<4x8x8xf32>
    %168 = math.exp %167 : vector<4x8x8xf32>
    %cst_52 = arith.constant dense<0.000000e+00> : vector<4x8xf32>
    %169 = vector.multi_reduction <add>, %168, %cst_52 [2] : vector<4x8x8xf32> to vector<4x8xf32>
    %170 = vector.shape_cast %169 : vector<4x8xf32> to vector<4x8x1xf32>
    %171 = tpu.reciprocal %170 {approx = true} : vector<4x8x1xf32> -> vector<4x8x1xf32>
    %172 = vector.broadcast %171 : vector<4x8x1xf32> to vector<4x8x8xf32>
    %173 = arith.mulf %168, %172 : vector<4x8x8xf32>
    %174 = arith.truncf %173 : vector<4x8x8xf32> to vector<4x8x8xbf16>
    "tpu.trace_start"() <{level = 10 : i32, message = "bqk,bkd->bqd"}> : () -> ()
    %cst_53 = arith.constant dense<0.000000e+00> : vector<4x8x8xf32>
    %175 = tpu.matmul %174, %162, %cst_53 {dimension_numbers = #tpu.dot_dimension_numbers<[2], [1], [1], [2], [0, 0, 0, 1, 1, 2], [0], [0]>} : vector<4x8x8xbf16>, vector<4x8x8xbf16>, vector<4x8x8xf32> -> vector<4x8x8xf32>
    "tpu.trace_stop"() : () -> ()
    %176 = vector.shape_cast %175 : vector<4x8x8xf32> to vector<4x1x8x8xf32>
    %177 = vector.extract_strided_slice %176 {offsets = [0, 0, 0, 0], sizes = [1, 1, 8, 8], strides = [1, 1, 1, 1]} : vector<4x1x8x8xf32> to vector<1x1x8x8xf32>
    %178 = vector.shape_cast %177 : vector<1x1x8x8xf32> to vector<1x8x8xf32>
    %179 = vector.extract_strided_slice %176 {offsets = [1, 0, 0, 0], sizes = [1, 1, 8, 8], strides = [1, 1, 1, 1]} : vector<4x1x8x8xf32> to vector<1x1x8x8xf32>
    %180 = vector.shape_cast %179 : vector<1x1x8x8xf32> to vector<1x8x8xf32>
    %181 = vector.extract_strided_slice %176 {offsets = [2, 0, 0, 0], sizes = [1, 1, 8, 8], strides = [1, 1, 1, 1]} : vector<4x1x8x8xf32> to vector<1x1x8x8xf32>
    %182 = vector.shape_cast %181 : vector<1x1x8x8xf32> to vector<1x8x8xf32>
    %183 = vector.extract_strided_slice %176 {offsets = [3, 0, 0, 0], sizes = [1, 1, 8, 8], strides = [1, 1, 1, 1]} : vector<4x1x8x8xf32> to vector<1x1x8x8xf32>
    %184 = vector.shape_cast %183 : vector<1x1x8x8xf32> to vector<1x8x8xf32>
    %185 = tpu.concatenate %178, %180, %182, %184 in 2 : vector<1x8x8xf32>, vector<1x8x8xf32>, vector<1x8x8xf32>, vector<1x8x8xf32> -> vector<1x8x32xf32>
    %186 = vector.shape_cast %185 : vector<1x8x32xf32> to vector<8x32xf32>
    %187 = arith.truncf %186 : vector<8x32xf32> to vector<8x32xbf16>
    %c0_54 = arith.constant 0 : index
    %c0_55 = arith.constant 0 : index
    %188 = vector.load %arg17[%c0_54, %c0_55] : memref<32x32xbf16, #tpu.memory_space<vmem>>, vector<32x32xbf16>
    %cst_56 = arith.constant dense<0.000000e+00> : vector<8x32xf32>
    %189 = tpu.matmul %187, %188, %cst_56 {dimension_numbers = #tpu.dot_dimension_numbers<[1], [0], [0], [1], [0, 0, 1, 1], [], []>} : vector<8x32xbf16>, vector<32x32xbf16>, vector<8x32xf32> -> vector<8x32xf32>
    %c0_57 = arith.constant 0 : index
    %c0_58 = arith.constant 0 : index
    %190 = vector.load %arg18[%c0_57, %c0_58] : memref<1x32xf32, #tpu.memory_space<vmem>>, vector<1x32xf32>
    %191 = vector.broadcast %190 : vector<1x32xf32> to vector<8x32xf32>
    %192 = arith.addf %189, %191 : vector<8x32xf32>
    %193 = arith.addf %108, %192 : vector<8x32xf32>
    %cst_59 = arith.constant dense<0.000000e+00> : vector<8xf32>
    %194 = vector.multi_reduction <add>, %193, %cst_59 [1] : vector<8x32xf32> to vector<8xf32>
    %195 = vector.shape_cast %194 : vector<8xf32> to vector<8x1xf32>
    %cst_60 = arith.constant 3.200000e+01 : f32
    %196 = vector.broadcast %cst_60 : f32 to vector<8x1xf32>
    %197 = arith.divf %195, %196 : vector<8x1xf32>
    %198 = vector.broadcast %197 : vector<8x1xf32> to vector<8x32xf32>
    %199 = arith.subf %193, %198 : vector<8x32xf32>
    %200 = arith.mulf %199, %199 : vector<8x32xf32>
    %cst_61 = arith.constant dense<0.000000e+00> : vector<8xf32>
    %201 = vector.multi_reduction <add>, %200, %cst_61 [1] : vector<8x32xf32> to vector<8xf32>
    %202 = vector.shape_cast %201 : vector<8xf32> to vector<8x1xf32>
    %cst_62 = arith.constant 3.200000e+01 : f32
    %203 = vector.broadcast %cst_62 : f32 to vector<8x1xf32>
    %204 = arith.divf %202, %203 : vector<8x1xf32>
    %cst_63 = arith.constant 9.99999974E-6 : f32
    %205 = vector.broadcast %cst_63 : f32 to vector<8x1xf32>
    %206 = arith.addf %204, %205 : vector<8x1xf32>
    %207 = math.rsqrt %206 : vector<8x1xf32>
    %208 = vector.broadcast %207 : vector<8x1xf32> to vector<8x32xf32>
    %209 = arith.mulf %199, %208 : vector<8x32xf32>
    %c0_64 = arith.constant 0 : index
    %c0_65 = arith.constant 0 : index
    %210 = vector.load %arg25[%c0_64, %c0_65] : memref<1x32xf32, #tpu.memory_space<vmem>>, vector<1x32xf32>
    %211 = vector.broadcast %210 : vector<1x32xf32> to vector<8x32xf32>
    %212 = arith.mulf %209, %211 : vector<8x32xf32>
    %c0_66 = arith.constant 0 : index
    %c0_67 = arith.constant 0 : index
    %213 = vector.load %arg26[%c0_66, %c0_67] : memref<1x32xf32, #tpu.memory_space<vmem>>, vector<1x32xf32>
    %214 = vector.broadcast %213 : vector<1x32xf32> to vector<8x32xf32>
    %215 = arith.addf %212, %214 : vector<8x32xf32>
    %216 = arith.truncf %215 : vector<8x32xf32> to vector<8x32xbf16>
    %c0_68 = arith.constant 0 : index
    %c0_69 = arith.constant 0 : index
    %217 = vector.load %arg19[%c0_68, %c0_69] : memref<32x64xbf16, #tpu.memory_space<vmem>>, vector<32x64xbf16>
    %cst_70 = arith.constant dense<0.000000e+00> : vector<8x64xf32>
    %218 = tpu.matmul %216, %217, %cst_70 {dimension_numbers = #tpu.dot_dimension_numbers<[1], [0], [0], [1], [0, 0, 1, 1], [], []>} : vector<8x32xbf16>, vector<32x64xbf16>, vector<8x64xf32> -> vector<8x64xf32>
    %c0_71 = arith.constant 0 : index
    %c0_72 = arith.constant 0 : index
    %219 = vector.load %arg20[%c0_71, %c0_72] : memref<1x64xf32, #tpu.memory_space<vmem>>, vector<1x64xf32>
    %220 = vector.broadcast %219 : vector<1x64xf32> to vector<8x64xf32>
    %221 = arith.addf %218, %220 : vector<8x64xf32>
    %cst_73 = arith.constant 0.000000e+00 : f32
    %222 = vector.broadcast %cst_73 : f32 to vector<8x64xf32>
    %223 = arith.maximumf %221, %222 : vector<8x64xf32>
    %224 = arith.truncf %223 : vector<8x64xf32> to vector<8x64xbf16>
    %c0_74 = arith.constant 0 : index
    %c0_75 = arith.constant 0 : index
    %225 = vector.load %arg21[%c0_74, %c0_75] : memref<64x32xbf16, #tpu.memory_space<vmem>>, vector<64x32xbf16>
    %cst_76 = arith.constant dense<0.000000e+00> : vector<8x32xf32>
    %226 = tpu.matmul %224, %225, %cst_76 {dimension_numbers = #tpu.dot_dimension_numbers<[1], [0], [0], [1], [0, 0, 1, 1], [], []>} : vector<8x64xbf16>, vector<64x32xbf16>, vector<8x32xf32> -> vector<8x32xf32>
    %c0_77 = arith.constant 0 : index
    %c0_78 = arith.constant 0 : index
    %227 = vector.load %arg22[%c0_77, %c0_78] : memref<1x32xf32, #tpu.memory_space<vmem>>, vector<1x32xf32>
    %228 = vector.broadcast %227 : vector<1x32xf32> to vector<8x32xf32>
    %229 = arith.addf %226, %228 : vector<8x32xf32>
    %230 = arith.addf %215, %229 : vector<8x32xf32>
    %cst_79 = arith.constant dense<0.000000e+00> : vector<8xf32>
    %231 = vector.multi_reduction <add>, %230, %cst_79 [1] : vector<8x32xf32> to vector<8xf32>
    %232 = vector.shape_cast %231 : vector<8xf32> to vector<8x1xf32>
    %cst_80 = arith.constant 3.200000e+01 : f32
    %233 = vector.broadcast %cst_80 : f32 to vector<8x1xf32>
    %234 = arith.divf %232, %233 : vector<8x1xf32>
    %235 = vector.broadcast %234 : vector<8x1xf32> to vector<8x32xf32>
    %236 = arith.subf %230, %235 : vector<8x32xf32>
    %237 = arith.mulf %236, %236 : vector<8x32xf32>
    %cst_81 = arith.constant dense<0.000000e+00> : vector<8xf32>
    %238 = vector.multi_reduction <add>, %237, %cst_81 [1] : vector<8x32xf32> to vector<8xf32>
    %239 = vector.shape_cast %238 : vector<8xf32> to vector<8x1xf32>
    %cst_82 = arith.constant 3.200000e+01 : f32
    %240 = vector.broadcast %cst_82 : f32 to vector<8x1xf32>
    %241 = arith.divf %239, %240 : vector<8x1xf32>
    %cst_83 = arith.constant 9.99999974E-6 : f32
    %242 = vector.broadcast %cst_83 : f32 to vector<8x1xf32>
    %243 = arith.addf %241, %242 : vector<8x1xf32>
    %244 = math.rsqrt %243 : vector<8x1xf32>
    %245 = vector.broadcast %244 : vector<8x1xf32> to vector<8x32xf32>
    %246 = arith.mulf %236, %245 : vector<8x32xf32>
    %c0_84 = arith.constant 0 : index
    %c0_85 = arith.constant 0 : index
    %247 = vector.load %arg27[%c0_84, %c0_85] : memref<1x32xf32, #tpu.memory_space<vmem>>, vector<1x32xf32>
    %248 = vector.broadcast %247 : vector<1x32xf32> to vector<8x32xf32>
    %249 = arith.mulf %246, %248 : vector<8x32xf32>
    %c0_86 = arith.constant 0 : index
    %c0_87 = arith.constant 0 : index
    %250 = vector.load %arg28[%c0_86, %c0_87] : memref<1x32xf32, #tpu.memory_space<vmem>>, vector<1x32xf32>
    %251 = vector.broadcast %250 : vector<1x32xf32> to vector<8x32xf32>
    %252 = arith.addf %249, %251 : vector<8x32xf32>
    %c0_88 = arith.constant 0 : index
    %c0_89 = arith.constant 0 : index
    %253 = vector.load %arg29[%c0_88, %c0_89] : memref<8x32xf32, #tpu.memory_space<vmem>>, vector<8x32xf32>
    tpu.vector_store %arg29[%c0_88, %c0_89], %252 {strides = array<i32>} : memref<8x32xf32, #tpu.memory_space<vmem>>, vector<8x32xf32>,
    return
  }
  func.func @transform_0(%arg0: i32) -> (i32, i32) {
    %c0_i32 = arith.constant 0 : i32
    %c0_i32_0 = arith.constant 0 : i32
    return %arg0, %c0_i32 : i32, i32
  }
  func.func @transform_1(%arg0: i32) -> (i32, i32) {
    %c0_i32 = arith.constant 0 : i32
    %c0_i32_0 = arith.constant 0 : i32
    return %arg0, %c0_i32 : i32, i32
  }
  func.func @transform_2(%arg0: i32) -> (i32, i32) {
    %c0_i32 = arith.constant 0 : i32
    %c0_i32_0 = arith.constant 0 : i32
    %c0_i32_1 = arith.constant 0 : i32
    return %c0_i32, %c0_i32_0 : i32, i32
  }
  func.func @transform_3(%arg0: i32) -> (i32, i32) {
    %c0_i32 = arith.constant 0 : i32
    %c0_i32_0 = arith.constant 0 : i32
    %c0_i32_1 = arith.constant 0 : i32
    return %c0_i32, %c0_i32_0 : i32, i32
  }
  func.func @transform_4(%arg0: i32) -> (i32, i32) {
    %c0_i32 = arith.constant 0 : i32
    %c0_i32_0 = arith.constant 0 : i32
    %c0_i32_1 = arith.constant 0 : i32
    return %c0_i32, %c0_i32_0 : i32, i32
  }
  func.func @transform_5(%arg0: i32) -> (i32, i32) {
    %c0_i32 = arith.constant 0 : i32
    %c0_i32_0 = arith.constant 0 : i32
    %c0_i32_1 = arith.constant 0 : i32
    return %c0_i32, %c0_i32_0 : i32, i32
  }
  func.func @transform_6(%arg0: i32) -> (i32, i32) {
    %c0_i32 = arith.constant 0 : i32
    %c0_i32_0 = arith.constant 0 : i32
    %c0_i32_1 = arith.constant 0 : i32
    return %c0_i32, %c0_i32_0 : i32, i32
  }
  func.func @transform_7(%arg0: i32) -> (i32, i32) {
    %c0_i32 = arith.constant 0 : i32
    %c0_i32_0 = arith.constant 0 : i32
    %c0_i32_1 = arith.constant 0 : i32
    return %c0_i32, %c0_i32_0 : i32, i32
  }
  func.func @transform_8(%arg0: i32) -> (i32, i32) {
    %c0_i32 = arith.constant 0 : i32
    %c0_i32_0 = arith.constant 0 : i32
    %c0_i32_1 = arith.constant 0 : i32
    return %c0_i32, %c0_i32_0 : i32, i32
  }
  func.func @transform_9(%arg0: i32) -> (i32, i32) {
    %c0_i32 = arith.constant 0 : i32
    %c0_i32_0 = arith.constant 0 : i32
    %c0_i32_1 = arith.constant 0 : i32
    return %c0_i32, %c0_i32_0 : i32, i32
  }
  func.func @transform_10(%arg0: i32) -> (i32, i32) {
    %c0_i32 = arith.constant 0 : i32
    %c0_i32_0 = arith.constant 0 : i32
    %c0_i32_1 = arith.constant 0 : i32
    return %c0_i32, %c0_i32_0 : i32, i32
  }
  func.func @transform_11(%arg0: i32) -> (i32, i32) {
    %c0_i32 = arith.constant 0 : i32
    %c0_i32_0 = arith.constant 0 : i32
    %c0_i32_1 = arith.constant 0 : i32
    return %c0_i32, %c0_i32_0 : i32, i32
  }
  func.func @transform_12(%arg0: i32) -> (i32, i32) {
    %c0_i32 = arith.constant 0 : i32
    %c0_i32_0 = arith.constant 0 : i32
    %c0_i32_1 = arith.constant 0 : i32
    return %c0_i32, %c0_i32_0 : i32, i32
  }
  func.func @transform_13(%arg0: i32) -> (i32, i32) {
    %c0_i32 = arith.constant 0 : i32
    %c0_i32_0 = arith.constant 0 : i32
    %c0_i32_1 = arith.constant 0 : i32
    return %c0_i32, %c0_i32_0 : i32, i32
  }
  func.func @transform_14(%arg0: i32) -> (i32, i32) {
    %c0_i32 = arith.constant 0 : i32
    %c0_i32_0 = arith.constant 0 : i32
    %c0_i32_1 = arith.constant 0 : i32
    return %c0_i32, %c0_i32_0 : i32, i32
  }
  func.func @transform_15(%arg0: i32) -> (i32, i32) {
    %c0_i32 = arith.constant 0 : i32
    %c0_i32_0 = arith.constant 0 : i32
    %c0_i32_1 = arith.constant 0 : i32
    return %c0_i32, %c0_i32_0 : i32, i32
  }
  func.func @transform_16(%arg0: i32) -> (i32, i32) {
    %c0_i32 = arith.constant 0 : i32
    %c0_i32_0 = arith.constant 0 : i32
    %c0_i32_1 = arith.constant 0 : i32
    return %c0_i32, %c0_i32_0 : i32, i32
  }
  func.func @transform_17(%arg0: i32) -> (i32, i32) {
    %c0_i32 = arith.constant 0 : i32
    %c0_i32_0 = arith.constant 0 : i32
    %c0_i32_1 = arith.constant 0 : i32
    return %c0_i32, %c0_i32_0 : i32, i32
  }
  func.func @transform_18(%arg0: i32) -> (i32, i32) {
    %c0_i32 = arith.constant 0 : i32
    %c0_i32_0 = arith.constant 0 : i32
    %c0_i32_1 = arith.constant 0 : i32
    return %c0_i32, %c0_i32_0 : i32, i32
  }
  func.func @transform_19(%arg0: i32) -> (i32, i32) {
    %c0_i32 = arith.constant 0 : i32
    %c0_i32_0 = arith.constant 0 : i32
    %c0_i32_1 = arith.constant 0 : i32
    return %c0_i32, %c0_i32_0 : i32, i32
  }
  func.func @transform_20(%arg0: i32) -> (i32, i32) {
    %c0_i32 = arith.constant 0 : i32
    %c0_i32_0 = arith.constant 0 : i32
    %c0_i32_1 = arith.constant 0 : i32
    return %c0_i32, %c0_i32_0 : i32, i32
  }
  func.func @transform_21(%arg0: i32) -> (i32, i32) {
    %c0_i32 = arith.constant 0 : i32
    %c0_i32_0 = arith.constant 0 : i32
    %c0_i32_1 = arith.constant 0 : i32
    return %c0_i32, %c0_i32_0 : i32, i32
  }
  func.func @transform_22(%arg0: i32) -> (i32, i32) {
    %c0_i32 = arith.constant 0 : i32
    %c0_i32_0 = arith.constant 0 : i32
    %c0_i32_1 = arith.constant 0 : i32
    return %c0_i32, %c0_i32_0 : i32, i32
  }
  func.func @transform_23(%arg0: i32) -> (i32, i32) {
    %c0_i32 = arith.constant 0 : i32
    %c0_i32_0 = arith.constant 0 : i32
    %c0_i32_1 = arith.constant 0 : i32
    return %c0_i32, %c0_i32_0 : i32, i32
  }
  func.func @transform_24(%arg0: i32) -> (i32, i32) {
    %c0_i32 = arith.constant 0 : i32
    %c0_i32_0 = arith.constant 0 : i32
    %c0_i32_1 = arith.constant 0 : i32
    return %c0_i32, %c0_i32_0 : i32, i32
  }
  func.func @transform_25(%arg0: i32) -> (i32, i32) {
    %c0_i32 = arith.constant 0 : i32
    %c0_i32_0 = arith.constant 0 : i32
    %c0_i32_1 = arith.constant 0 : i32
    return %c0_i32, %c0_i32_0 : i32, i32
  }
  func.func @transform_26(%arg0: i32) -> (i32, i32) {
    %c0_i32 = arith.constant 0 : i32
    %c0_i32_0 = arith.constant 0 : i32
    %c0_i32_1 = arith.constant 0 : i32
    return %c0_i32, %c0_i32_0 : i32, i32
  }
  func.func @transform_27(%arg0: i32) -> (i32, i32) {
    %c0_i32 = arith.constant 0 : i32
    %c0_i32_0 = arith.constant 0 : i32
    %c0_i32_1 = arith.constant 0 : i32
    return %c0_i32, %c0_i32_0 : i32, i32
  }
  func.func @transform_28(%arg0: i32) -> (i32, i32) {
    %c0_i32 = arith.constant 0 : i32
    %c0_i32_0 = arith.constant 0 : i32
    return %arg0, %c0_i32 : i32, i32
  }
}

</mosaic_0001>

<bundles_post_ra>
// kernel: tpu_custom_call.1
= control target key start
LH: loop header
LB: loop body
LE: loop exit
PB: predicated region body
PF: predicated region fallthrough
CT: control target
= control target key end

     0   :  { %s3874_s0 = inlined_call_operand.vmem [shape: f32[16,32], index: 0, kind: input, shape index: {}]   ;;  %s3875_s1 = inlined_call_operand.vmem [shape: f32[16,32], index: 1, kind: input, shape index: {}]   ;;  %s3876_s2 = inlined_call_operand.vmem [shape: bf16[32,32], index: 2, kind: input, shape index: {}]   ;;  %s3877_s3 = inlined_call_operand.vmem [shape: f32[1,32], index: 3, kind: input, shape index: {}]   ;;  %s3878_s4 = inlined_call_operand.hbm [shape: bf16[32,32], index: 4, kind: input, shape index: {}]   ;;  %s3879_s5 = inlined_call_operand.vmem [shape: f32[1,32], index: 5, kind: input, shape index: {}]   ;;  %s3880_s6 = inlined_call_operand.hbm [shape: bf16[32,32], index: 6, kind: input, shape index: {}]   ;;  %s3881_s7 = inlined_call_operand.vmem [shape: f32[1,32], index: 7, kind: input, shape index: {}]   ;;  %s3882_s8 = inlined_call_operand.hbm [shape: bf16[32,32], index: 8, kind: input, shape index: {}]   ;;  %s3883_s9 = inlined_call_operand.hbm [shape: f32[1,32], index: 9, kind: input, shape index: {}]   ;;  %s3884_s10 = inlined_call_operand.hbm [shape: bf16[32,32], index: 10, kind: input, shape index: {}]   ;;  %s3885_s11 = inlined_call_operand.hbm [shape: f32[1,32], index: 11, kind: input, shape index: {}]   ;;  %s3886_s12 = inlined_call_operand.hbm [shape: bf16[32,32], index: 12, kind: input, shape index: {}]   ;;  %s3887_s13 = inlined_call_operand.hbm [shape: f32[1,32], index: 13, kind: input, shape index: {}]   ;;  %s3888_s14 = inlined_call_operand.hbm [shape: bf16[32,32], index: 14, kind: input, shape index: {}]   ;;  %s3889_s15 = inlined_call_operand.hbm [shape: f32[1,32], index: 15, kind: input, shape index: {}]   ;;  %s3890_s16 = inlined_call_operand.hbm [shape: bf16[32,32], index: 16, kind: input, shape index: {}]   ;;  %s3891_s17 = inlined_call_operand.hbm [shape: f32[1,32], index: 17, kind: input, shape index: {}]   ;;  %s3892_s18 = inlined_call_operand.hbm [shape: bf16[32,64], index: 18, kind: input, shape index: {}]   ;;  %s3893_s19 = inlined_call_operand.hbm [shape: f32[1,64], index: 19, kind: input, shape index: {}]   ;;  %s3894_s20 = inlined_call_operand.vmem [shape: bf16[64,32], index: 20, kind: input, shape index: {}]   ;;  %s3895_s21 = inlined_call_operand.vmem [shape: f32[1,32], index: 21, kind: input, shape index: {}]   ;;  %s3896_s22 = inlined_call_operand.vmem [shape: f32[1,32], index: 22, kind: input, shape index: {}]   ;;  %s3897_s23 = inlined_call_operand.vmem [shape: f32[1,32], index: 23, kind: input, shape index: {}]   ;;  %s3898_s24 = inlined_call_operand.vmem [shape: f32[1,32], index: 24, kind: input, shape index: {}]   ;;  %s3899_s25 = inlined_call_operand.vmem [shape: f32[1,32], index: 25, kind: input, shape index: {}]   ;;  %s3900_s26 = inlined_call_operand.hbm [shape: f32[1,32], index: 26, kind: input, shape index: {}]   ;;  %s3901_s27 = inlined_call_operand.vmem [shape: f32[1,32], index: 27, kind: input, shape index: {}]   ;;  %s3902_s28 = inlined_call_operand.hbm [shape: f32[16,32], index: 28, kind: output, shape index: {}]  }
   0x1   :  { %3916 = sst [smem:[#allocation44_spill]] %s3874_s0 }
   0x2   :  { %3917 = sst [smem:[#allocation45_spill]] %s3875_s1 }
   0x3   :  { %3918 = sst [smem:[#allocation46_spill]] %s3876_s2 }
   0x4   :  { %3919 = sst [smem:[#allocation47_spill]] %s3877_s3 }
   0x5   :  { %3920 = sst [smem:[#allocation48_spill]] %s3878_s4 }
   0x6   :  { %3921 = sst [smem:[#allocation49_spill]] %s3879_s5 }
   0x7   :  { %3922 = sst [smem:[#allocation50_spill]] %s3880_s6 }
   0x8   :  { %3923 = sst [smem:[#allocation51_spill]] %s3881_s7 }
   0x9   :  { %3924 = sst [smem:[#allocation52_spill]] %s3882_s8 }
   0xa   :  { %3925 = sst [smem:[#allocation53_spill]] %s3883_s9 }
   0xb   :  { %3926 = sst [smem:[#allocation54_spill]] %s3884_s10 }
   0xc   :  { %3927 = sst [smem:[#allocation55_spill]] %s3885_s11 }
   0xd   :  { %3928 = sst [smem:[#allocation56_spill]] %s3886_s12 }
   0xe   :  { %3929 = sst [smem:[#allocation57_spill]] %s3895_s21 }
   0xf   :  { %3930 = sst [smem:[#allocation58_spill]] %s3899_s25 }
  0x10   :  { %3931 = sst [smem:[#allocation59_spill]] %s3901_s27 }
  0x11   :  { %3932 = sst [smem:[#allocation60_spill]] %s3902_s28 }
  0x12   :  { %33 = vsyncpa [#allocation3], 0 }
  0x13   :  { %34 = vsyncpa [#allocation6], 0 }
  0x14   :  { %35 = vsyncpa [#allocation9], 0 }
  0x15   :  { %36 = vsyncpa [#allocation12], 0 }
  0x16   :  { %37 = vsyncpa [#allocation15], 0 }
  0x17   :  { %38 = vsyncpa [#allocation18], 0 }
  0x18   :  { %39 = vsyncpa [#allocation21], 0 }
  0x19   :  { %40 = vsyncpa [#allocation24], 0 }
  0x1a   :  { %41 = vsyncpa [#allocation4], 0 }
  0x1b   :  { %43 = vsyncpa [#allocation4 + $0x1], 0  ;;  %s3476_s8 = smov 0   ;;  %s3478_s5 = smov 0  }
  0x1c   :  { %s3480_s9 = smov 0   ;;  %s3482_s30 = smov 0  }
  0x1d LB: > { %3933 = sst [smem:[#allocation36_spill]] %s3293_s8  ;;  %s3497_s3 = sadd.s32 4294967295, %s3305_s30   ;;  %s3305_s30 = sphi %s3482_s30, %s3970_s30   ;;  %s3301_s9 = sphi %s3480_s9, %s3973_s9   ;;  %s3297_s5 = sphi %s3478_s5, %s3972_s5   ;;  %s3293_s8 = sphi %s3476_s8, %s3971_s8  }
  0x1e   : > { %3934 = sst [smem:[#allocation37_spill]] %s3297_s5  ;;  %s2329_s6 = sadd.s32 4294967294, %s3305_s30  }
  0x1f   : > { %3935 = sst [smem:[#allocation38_spill]] %s3301_s9  ;;  %s3501_s10 = sadd.s32 1, %s3305_s30  }
  0x20   : > { %3936 = sst [smem:[#allocation39_spill]] %s3305_s30  ;;  %s654_s0 = sadd.s32 1, %s3301_s9 }
  0x21   : > { %3937 = sst [smem:[#allocation40_spill]] %s3501_s10  ;;  %s651_s11 = ssub.s32 %s3305_s30, %s3501_s10 }
  0x22   : > { %p664_p0 = scmp.ne.s32.totalorder %s3301_s9, %s3297_s5  ;;  %p652_p1 = scmp.eq.s32.totalorder %s651_s11, 0 }
  0x23   : > { %p665_p2 = scmp.eq.s32.totalorder %s3497_s3, 1  ;;  %p670_p3 = scmp.ne.s32.totalorder %s3297_s5, %s3293_s8 }
  0x24   : > { %p671_p4 = scmp.eq.s32.totalorder %s2329_s6, 1  ;;  %p2330_p7 = scmp.ge.s32.totalorder %s3305_s30, 1 }
  0x25   : > { %s3512_s29 = scalar_select %p652_p1, %s3301_s9, %s654_s0  }
  0x26   : > { %p3514_p5 = por %p665_p2, %p664_p0  ;;  %p3518_p6 = por %p671_p4, %p670_p3 }
  0x27   : > { %3938 = sst [smem:[#allocation41_spill]] %s3512_s29  ;;  %p678_p8 = scmp.lt.s32.totalorder %s3305_s30, 3 }
  0x28   : > { %s3939_s2 = scalar_select %p3514_p5, 1, 0 }
  0x29   : > { %s3941_s7 = scalar_select %p3518_p6, 1, 0 }
  0x2a   : > { %3940 = sst [smem:[#allocation42_spill]] %s3939_s2  ;;  %p2618_p9 = scmp.eq.s32.totalorder %s3497_s3, 0 }
  0x2b   : > { %3942 = sst [smem:[#allocation43_spill]] %s3941_s7  ;;  %p3525_p10 = pnand %p2330_p7, %p678_p8 }
  0x2c   : > { %s3944_s6 = sld [smem:[#allocation50_spill]]  ;;  %s3307_s8 = smov [#allocation5]  }
  0x2d   : > { %p2568_p11 = pneg %p3525_p10  ;;  %s3945_s9 = sld [smem:[#allocation53_spill]] }
  0x2e   : > { %s714_s30 = sshll.u32 %s3307_s8, 4  ;;  %s3914_s1 = smov 64   ;;  %s715_s30 = int_to_ptr.vmem [resolvable:$true] %s714_s30 }
  0x2f   : > { %p3539_p12 = pnand %p2618_p9, %p2568_p11  ;;  %s3309_s4 = smov 4  }
  0x30   : > { %s3947_s27 = sld [smem:[#allocation55_spill]]  ;;  %s796_s5 = sshll.u32 %s3887_s13, 4  ;;  %s797_s5 = int_to_ptr.hbm [resolvable:$true] %s796_s5 }
  0x31   : > { %s3311_s21 = smov [#allocation11]  }
  0x32   : > { %s712_s0 = sshll.u32 %s3944_s6, 4  ;;  %s772_s25 = sshll.u32 %s3311_s21, 4  ;;  %s713_s0 = int_to_ptr.hbm [resolvable:$true] %s712_s0  ;;  %s773_s25 = int_to_ptr.vmem [resolvable:$true] %s772_s25 }
  0x33   : > { %s744_s10 = sshll.u32 %s3945_s9, 4  ;;  %s3310_s9 = smov [#allocation8]   ;;  %s745_s10 = int_to_ptr.hbm [resolvable:$true] %s744_s10 }
  0x34   : > { %2574 = dma.hbm_to_vmem [thread:$0]  (!%p3539_p12), %s713_s0, 256, %s715_s30, [#allocation6], %s3914_s1, %s3914_s1, %s3309_s4  }
  0x35   : > { %s746_s29 = sshll.u32 %s3310_s9, 4  ;;  %s3312_s30 = smov [#allocation14]   ;;  %s747_s29 = int_to_ptr.vmem [resolvable:$true] %s746_s29 }
  0x36   : > { %s770_s2 = sshll.u32 %s3947_s27, 4  ;;  %s798_s0 = sshll.u32 %s3312_s30, 4  ;;  %s771_s2 = int_to_ptr.hbm [resolvable:$true] %s770_s2  ;;  %s799_s0 = int_to_ptr.vmem [resolvable:$true] %s798_s0 }
  0x37   : > { %2580 = dma.hbm_to_vmem [thread:$0]  (!%p3539_p12), %s745_s10, 16, %s747_s29, [#allocation9]  }
  0x38   : > { %2586 = dma.hbm_to_vmem [thread:$0]  (!%p3539_p12), %s771_s2, 16, %s773_s25, [#allocation12]  }
  0x39   : > { %s822_s27 = sshll.u32 %s3889_s15, 4  ;;  %s848_s29 = sshll.u32 %s3891_s17, 4  ;;  %s823_s27 = int_to_ptr.hbm [resolvable:$true] %s822_s27  ;;  %s849_s29 = int_to_ptr.hbm [resolvable:$true] %s848_s29 }
  0x3a   : > { %2592 = dma.hbm_to_vmem [thread:$0]  (!%p3539_p12), %s797_s5, 16, %s799_s0, [#allocation15]  }
  0x3b   : > { %s3313_s21 = smov [#allocation17]   ;;  %s3314_s25 = smov [#allocation20]  }
  0x3c   : > { %s824_s11 = sshll.u32 %s3313_s21, 4  ;;  %s850_s2 = sshll.u32 %s3314_s25, 4  ;;  %s825_s11 = int_to_ptr.vmem [resolvable:$true] %s824_s11  ;;  %s851_s2 = int_to_ptr.vmem [resolvable:$true] %s850_s2 }
  0x3d   : > { %2598 = dma.hbm_to_vmem [thread:$0]  (!%p3539_p12), %s823_s27, 16, %s825_s11, [#allocation18]  }
  0x3e   : > { %s874_s9 = sshll.u32 %s3893_s19, 4  ;;  %s3948_s6 = sld [smem:[#allocation48_spill]]  ;;  %s875_s9 = int_to_ptr.hbm [resolvable:$true] %s874_s9 }
  0x3f   : > { %2604 = dma.hbm_to_vmem [thread:$0]  (!%p3539_p12), %s849_s29, 16, %s851_s2, [#allocation21]  }
  0x40   : > { %s3315_s10 = smov [#allocation23]   ;;  %s3316_s27 = smov [#allocation2]  }
  0x41   : > { %s876_s21 = sshll.u32 %s3315_s10, 4  ;;  %s697_s11 = sshll.u32 %s3316_s27, 4  ;;  %s877_s21 = int_to_ptr.vmem [resolvable:$true] %s876_s21  ;;  %s698_s11 = int_to_ptr.vmem [resolvable:$true] %s697_s11 }
  0x42   : > { %2610 = dma.hbm_to_vmem [thread:$0]  (!%p3539_p12), %s875_s9, 16, %s877_s21, [#allocation24]  }
  0x43   : > { %s3949_s30 = sld [smem:[#allocation52_spill]]  ;;  %s3950_s29 = smov 64  }
  0x44   : > { %s695_s28 = sshll.u32 %s3948_s6, 4  ;;  %s3951_s0 = sld [smem:[#allocation54_spill]]  ;;  %s696_s28 = int_to_ptr.hbm [resolvable:$true] %s695_s28 }
  0x45   : > { %2571 = dma.hbm_to_vmem [thread:$0]  (!%p3539_p12), %s696_s28, 256, %s698_s11, [#allocation3], %s3950_s29, %s3950_s29, %s3309_s4  }
  0x46   : > { %s3317_s10 = smov [#allocation7]   ;;  %s3318_s21 = smov [#allocation10]  }
  0x47   : > { %s731_s9 = sshll.u32 %s3317_s10, 4  ;;  %s757_s27 = sshll.u32 %s3318_s21, 4  ;;  %s732_s9 = int_to_ptr.vmem [resolvable:$true] %s731_s9  ;;  %s758_s27 = int_to_ptr.vmem [resolvable:$true] %s757_s27 }
  0x48   : > { %s807_s5 = sshll.u32 %s3888_s14, 4  ;;  %s3320_s10 = smov [#allocation16]   ;;  %s808_s5 = int_to_ptr.hbm [resolvable:$true] %s807_s5 }
  0x49   : > { %s729_s1 = sshll.u32 %s3949_s30, 4  ;;  %s3952_s30 = sld [smem:[#allocation56_spill]]  ;;  %s730_s1 = int_to_ptr.hbm [resolvable:$true] %s729_s1 }
  0x4a   : > { %s755_s6 = sshll.u32 %s3951_s0, 4  ;;  %s3319_s0 = smov [#allocation13]   ;;  %s756_s6 = int_to_ptr.hbm [resolvable:$true] %s755_s6 }
  0x4b   : > { %2577 = dma.hbm_to_vmem [thread:$0]  (!%p3539_p12), %s730_s1, 256, %s732_s9, [#allocation6], %s3950_s29, %s3950_s29, %s3309_s4  }
  0x4c   : > { %2583 = dma.hbm_to_vmem [thread:$0]  (!%p3539_p12), %s756_s6, 256, %s758_s27, [#allocation9], %s3950_s29, %s3950_s29, %s3309_s4  }
  0x4d   : > { %s783_s1 = sshll.u32 %s3319_s0, 4  ;;  %s809_s9 = sshll.u32 %s3320_s10, 4  ;;  %s784_s1 = int_to_ptr.vmem [resolvable:$true] %s783_s1  ;;  %s810_s9 = int_to_ptr.vmem [resolvable:$true] %s809_s9 }
  0x4e   : > { %s833_s6 = sshll.u32 %s3890_s16, 4  ;;  %s3322_s2 = smov [#allocation22]   ;;  %s834_s6 = int_to_ptr.hbm [resolvable:$true] %s833_s6 }
  0x4f   : > { %s781_s28 = sshll.u32 %s3952_s30, 4  ;;  %s859_s30 = sshll.u32 %s3892_s18, 4  ;;  %s782_s28 = int_to_ptr.hbm [resolvable:$true] %s781_s28  ;;  %s860_s30 = int_to_ptr.hbm [resolvable:$true] %s859_s30 }
  0x50   : > { %2589 = dma.hbm_to_vmem [thread:$0]  (!%p3539_p12), %s782_s28, 256, %s784_s1, [#allocation12], %s3950_s29, %s3950_s29, %s3309_s4  }
  0x51   : > { %2595 = dma.hbm_to_vmem [thread:$0]  (!%p3539_p12), %s808_s5, 256, %s810_s9, [#allocation15], %s3950_s29, %s3950_s29, %s3309_s4  }
  0x52   : > { %s3321_s28 = smov [#allocation19]   ;;  %s861_s0 = sshll.u32 %s3322_s2, 4  ;;  %s862_s0 = int_to_ptr.vmem [resolvable:$true] %s861_s0 }
  0x53   : > { %s835_s11 = sshll.u32 %s3321_s28, 4  ;;  %s904_s5 = sshll.u32 %s3900_s26, 4  ;;  %s836_s11 = int_to_ptr.vmem [resolvable:$true] %s835_s11  ;;  %s905_s5 = int_to_ptr.hbm [resolvable:$true] %s904_s5 }
  0x54   : > { %2601 = dma.hbm_to_vmem [thread:$0]  (!%p3539_p12), %s834_s6, 256, %s836_s11, [#allocation18], %s3950_s29, %s3950_s29, %s3309_s4  }
  0x55   : > { %2607 = dma.hbm_to_vmem [thread:$0]  (!%p3539_p12), %s860_s30, 256, %s862_s0, [#allocation21], %s3950_s29, %s3950_s29, %s3309_s4  }
  0x56   : > { %s3323_s9 = smov [#allocation25]   ;;  %936 = sbr.rel (%p3525_p10) target bundleno = 3265 (0xcc1), region = 132 }
  0x57   : > { %s906_s21 = sshll.u32 %s3323_s9, 4  ;;  %s907_s21 = int_to_ptr.vmem [resolvable:$true] %s906_s21 }
  0x58   : > { %2613 = dma.hbm_to_vmem [thread:$0]  (!%p3539_p12), %s905_s5, 16, %s907_s21, [#allocation24]  }
  0x5b   : > { %3256 = dma.done.wait (%p2618_p9), [#allocation3], 256  }
  0x5c   : > { %3258 = vsyncadd (%p2618_p9), [#allocation3], 4294967040 }
  0x5d   : > { %3260 = dma.done.wait (%p2618_p9), [#allocation6], 512  }
  0x5e   : > { %3262 = vsyncadd (%p2618_p9), [#allocation6], 4294966784 }
  0x5f   : > { %3264 = dma.done.wait (%p2618_p9), [#allocation9], 272  }
  0x60   : > { %3266 = vsyncadd (%p2618_p9), [#allocation9], 4294967024 }
  0x61   : > { %3268 = dma.done.wait (%p2618_p9), [#allocation12], 272  }
  0x62   : > { %3270 = vsyncadd (%p2618_p9), [#allocation12], 4294967024 }
  0x63   : > { %3272 = dma.done.wait (%p2618_p9), [#allocation15], 272  }
  0x64   : > { %3274 = vsyncadd (%p2618_p9), [#allocation15], 4294967024 }
  0x65   : > { %3276 = dma.done.wait (%p2618_p9), [#allocation18], 272  }
  0x66   : > { %3278 = vsyncadd (%p2618_p9), [#allocation18], 4294967024 }
  0x67   : > { %3280 = dma.done.wait (%p2618_p9), [#allocation21], 272  }
  0x68   : > { %3282 = vsyncadd (%p2618_p9), [#allocation21], 4294967024 }
  0x69   : > { %3284 = dma.done.wait (%p2618_p9), [#allocation24], 32  }
  0x6a   : > { %3286 = vsyncadd (%p2618_p9), [#allocation24], 4294967264  ;;  %p1084_p13 = scmp.lt.s32.totalorder %s3497_s3, 1  ;;  %s3953_s25 = sld [smem:[#allocation44_spill]]  ;;  %v2487_v0 = vld [vmem:[#allocation2 + $0x8] sm:$0xff]  ;;  %v2486_v2 = vld [vmem:[#allocation2] sm:$0xff] }
  0x6b   : > { %s3954_s30 = sld [smem:[#allocation46_spill]]  ;;  %1159 = vmatpush.bf16.msra.mxu1 %v2487_v0  ;;  %vm1116_vm0 = vcmask 261120   ;;  %vm1241_vm1 = vcmask 64512   ;;  %s3324_s4 = smov 120   ;;  %v2489_v17 = vld [vmem:[#allocation5 + $0x8] sm:$0xff]  ;;  %v2488_v18 = vld [vmem:[#allocation5] sm:$0xff] }
  0x6c   : > { %s3672_s7 = scalar_select %p1084_p13, %s3497_s3, 1  ;;  %1192 = vmatpush.bf16.msra.mxu2 %v2489_v17  ;;  %vm1369_vm2 = vcmask 1043456   ;;  %vm1456_vm3 = vcmask 130048   ;;  %vm1458_vm4 = vcmask 195584   ;;  %vm2046_vm12 = vcmask 523264  }
  0x6d   : > { %s3956_s10 = sld [smem:[#allocation49_spill]]  ;;  %s3325_s29 = smov 104  }
  0x6e   : > { %s2364_s12 = sshll.u32 %s3672_s7, 3  ;;  %s3957_s21 = sld [smem:[#allocation47_spill]] }
  0x6f   : > { %1160 = vmatpush.bf16.msra.mxu1 %v2486_v2  ;;  %s3958_s8 = sld [smem:[#allocation51_spill]]  ;;  %s3328_s11 = smov 8  }
  0x70   : > { %s1087_s6 = scalar_lea.vmem %s3953_s25, %s2364_s12  ;;  %s3326_s25 = smov 112   ;;  %1193 = vmatpush.bf16.msra.mxu2 %v2488_v18 }
  0x71   : > { %s3955_s28 = smov %s3954_s30  ;;  %v2485_v1 = vld [vmem:[%s3954_s30 + $0x8] sm:$0xff]  ;;  %v3686_v4 = vld [vmem:[%s1087_s6] sm:$0xff]  ;;  %s3327_s30 = smov 16  }
  0x72   : > { %v2484_v3 = vld [vmem:[%s3955_s28] sm:$0xff]  ;;  %1126 = vmatpush.bf16.msra.mxu0 %v2485_v1  ;;  %v1095_v5 = vpack.c.bf16 %v3686_v4, %v3686_v4  ;;  %s3329_s2 = smov 24   ;;  %s3961_s9 = sld [smem:[#allocation57_spill]] }
  0x73   : > { %v2705_v6 = vld [vmem:[%s3956_s10] ss:$0 sm:$0xff]  ;;  %s3959_s10 = sld [smem:[#allocation45_spill]] }
  0x74   : > { %2383 = vmatmul.msk.bf16.vlgmr.msra.gmra.mxu1 %vm1116_vm0, %v1095_v5  ;;  %v2706_v7 = vld [vmem:[%s3957_s21] ss:$0 sm:$0xff]  ;;  %2392 = vmatmul.msk.bf16.vlgmr.msra.gmra.mxu2 %vm1116_vm0, %v1095_v5  ;;  %s3962_s21 = sld [smem:[#allocation37_spill]] }
  0x75   : > { %v2707_v36 = vld [vmem:[%s3958_s8] ss:$0 sm:$0xff]  ;;  %s3963_s8 = sld [smem:[#allocation60_spill]] }
  0x76   : > { %1127 = vmatpush.bf16.msra.mxu0 %v2484_v3 }
  0x79   : > { %2374 = vmatmul.msk.bf16.vlgmr.msra.gmra.mxu0 %vm1116_vm0, %v1095_v5  ;;  %s1091_s5 = scalar_lea.vmem %s3959_s10, %s2364_s12  ;;  %s3966_s10 = sld [smem:[#allocation59_spill]] }
  0xf1   : > { %v1162_v8 = vpop.f32.mrf.mxu1 }
  0xf2   : > { %v1163_v10 = vadd.f32 %v2705_v6, %v1162_v8 }
  0xf4   : > { %1214 = vrot.lane.b32.xlu1 %v1163_v10, %s3324_s4  ;;  %1220 = vrot.lane.b32.xlu0 %v1163_v10, %s3325_s29  ;;  %v1223_v12 = vpack.c.bf16 %v1163_v10, %v1163_v10 }
  0xf6   : > { %v1129_v9 = vpop.f32.mrf.mxu0  ;;  %v1246_v13 = vsel %vm1241_vm1, %v1223_v12, 0 }
  0xf7   : > { %v1130_v11 = vadd.f32 %v2706_v7, %v1129_v9  ;;  %1255 = vmatpush.bf16.xpose.msra.mxu3 %v1246_v13  ;;  %v1195_v37 = vpop.f32.mrf.mxu2 }
  0xf8   : > { %v1196_v38 = vadd.f32 %v2707_v36, %v1195_v37 }
  0xf9   : > { %1200 = vrot.lane.b32.xlu2 %v1130_v11, %s3324_s4  ;;  %v1164_v14 = vpop.f32.mrf.mxu1  ;;  %v1209_v16 = vpack.c.bf16 %v1130_v11, %v1130_v11 }
  0xfa   : > { %v1237_v39 = vpack.c.bf16 %v1196_v38, %v1196_v38 }
  0xfc   : > { %1217 = vrot.lane.b32.xlu1 %v1163_v10, %s3326_s25  ;;  %1206 = vrot.lane.b32.xlu0 %v1130_v11, %s3325_s29  ;;  %v1371_v40 = vsel %vm1369_vm2, %v1237_v39, 0 }
  0xfe   : > { %v1131_v15 = vpop.f32.mrf.mxu0  ;;  %2393 = vmatmul.msk.bf16.vlgmr.msra.gmra.mxu3 %vm1241_vm1, %v1209_v16 }
  0xff   : > { %1380 = vmatpush.bf16.msrb.mxu3 %v1371_v40  ;;  %v1197_v41 = vpop.f32.mrf.mxu2 }
 0x101   : > { %1203 = vrot.lane.b32.xlu2 %v1130_v11, %s3326_s25 }
 0x153   : > { %v1201_v25 = vpop.permute.xlu2 %1200 }
 0x154   : > { %v1210_v28 = vpack.c.bf16 %v1201_v25, %v1201_v25 }
 0x15b   : > { %v1204_v32 = vpop.permute.xlu2 %1203 }
 0x15c   : > { %v1211_v33 = vpack.c.bf16 %v1204_v32, %v1204_v32 }
 0x166   : > { %v1215_v19 = vpop.permute.xlu1 %1214  ;;  %v1221_v20 = vpop.permute.xlu0 %1220 }
 0x167   : > { %v1224_v21 = vpack.c.bf16 %v1215_v19, %v1215_v19  ;;  %v1226_v22 = vpack.c.bf16 %v1221_v20, %v1221_v20 }
 0x169   : > { %v1265_v23 = vsel %vm1241_vm1, %v1224_v21, 0  ;;  %v1303_v24 = vsel %vm1241_vm1, %v1226_v22, 0 }
 0x16a   : > { %1274 = vmatpush.bf16.xpose.msrb.mxu0 %v1265_v23  ;;  %1312 = vmatpush.bf16.xpose.msrb.mxu2 %v1303_v24 }
 0x16e   : > { %v1218_v26 = vpop.permute.xlu1 %1217  ;;  %v1207_v27 = vpop.permute.xlu0 %1206 }
 0x16f   : > { %v1225_v29 = vpack.c.bf16 %v1218_v26, %v1218_v26  ;;  %v1212_v30 = vpack.c.bf16 %v1207_v27, %v1207_v27 }
 0x171   : > { %2394 = vmatmul.msk.bf16.vlgmr.msrb.gmra.mxu0 %vm1241_vm1, %v1210_v28  ;;  %2396 = vmatmul.msk.bf16.vlgmr.msrb.gmra.mxu2 %vm1241_vm1, %v1212_v30  ;;  %v1284_v31 = vsel %vm1241_vm1, %v1225_v29, 0 }
 0x172   : > { %1293 = vmatpush.bf16.xpose.msrb.mxu1 %v1284_v31 }
 0x179   : > { %2395 = vmatmul.msk.bf16.vlgmr.msrb.gmra.mxu1 %vm1241_vm1, %v1211_v33 }
 0x181   : > { %v1257_v34 = vpop.f32.mrf.mxu3 }
 0x182   : > { %v1318_v51 = vsel %vm1241_vm1, %v1257_v34, -inf }
 0x189   : > { %v1259_v35 = vpop.f32.mrf.mxu3 }
 0x1ee   : > { %v1276_v42 = vpop.f32.mrf.mxu0 }
 0x1ef   : > { %v1321_v43 = vsel %vm1241_vm1, %v1276_v42, -inf }
 0x1f0   : > { %1322 = vmax.xlane.f32.xlu1 %v1321_v43  ;;  %v2490_v43 = vld [vmem:[#allocation7] sm:$0xff] }
 0x1f4   : > { %v1314_v44 = vpop.f32.mrf.mxu2 }
 0x1f5   : > { %v1327_v45 = vsel %vm1241_vm1, %v1314_v44, -inf }
 0x1f6   : > { %v1278_v46 = vpop.f32.mrf.mxu0  ;;  %v1295_v47 = vpop.f32.mrf.mxu1  ;;  %1328 = vmax.xlane.f32.xlu0 %v1327_v45 }
 0x1f7   : > { %v1324_v48 = vsel %vm1241_vm1, %v1295_v47, -inf }
 0x1f8   : > { %1325 = vmax.xlane.f32.xlu2 %v1324_v48 }
 0x1fc   : > { %v1316_v49 = vpop.f32.mrf.mxu2 }
 0x1fe   : > { %v1297_v50 = vpop.f32.mrf.mxu1 }
 0x200   : > { %1319 = vmax.xlane.f32.xlu2 %v1318_v51  ;;  %v2708_v51 = vld [vmem:[#allocation8] ss:$0 sm:$0xff] }
 0x263   : > { %v1323_v52 = vpop.xlane.xlu1 %1322 }
 0x264   : > { %v1331_v53 = vsub.f32 %v1276_v42, %v1323_v52  ;;  %v2491_v42 = vld [vmem:[#allocation7 + $0x8] sm:$0xff] }
 0x265   : > { %1490 = vmatpush.bf16.msra.mxu3 %v2491_v42 }
 0x266   : > { %v1336_v54 = vmul.f32 1.442695, %v1331_v53 }
 0x268   : > { %2721 = vpow2.f32 %v1336_v54 }
 0x269   : > { %v1329_v55 = vpop.xlane.xlu0 %1328  ;;  %1491 = vmatpush.bf16.msra.mxu3 %v2490_v43 }
 0x26a   : > { %v1333_v56 = vsub.f32 %v1314_v44, %v1329_v55 }
 0x26b   : > { %v1326_v57 = vpop.xlane.xlu2 %1325 }
 0x26c   : > { %v1340_v58 = vmul.f32 1.442695, %v1333_v56  ;;  %v1332_v59 = vsub.f32 %v1295_v47, %v1326_v57  ;;  %v3330_v57 = vmov 32.0  }
 0x26e   : > { %v2722_v60 = vpop.eup %2721  ;;  %2723 = vpow2.f32 %v1340_v58  ;;  %v1338_v61 = vmul.f32 1.442695, %v1332_v59  ;;  %v2495_v58 = vld [vmem:[#allocation13 + $0x8] sm:$0xff]  ;;  %v1094_v59 = vld [vmem:[%s1091_s5] sm:$0xff] }
 0x26f   : > { %v1345_v62 = vsel %vm1241_vm1, %v2722_v60, 0.0 }
 0x270   : > { %2725 = vpow2.f32 %v1338_v61  ;;  %1346 = vadd.xlane.f32.xlu1 %v1345_v62  ;;  %v1574_v62 = vpack.c.bf16 %v1094_v59, %v1094_v59  ;;  %v2713_v59 = vld [vmem:[#allocation17] ss:$0 sm:$0xff] }
 0x273   : > { %v1320_v3 = vpop.xlane.xlu2 %1319 }
 0x274   : > { %v2724_v63 = vpop.eup %2723  ;;  %v1330_v5 = vsub.f32 %v1257_v34, %v1320_v3 }
 0x275   : > { %v1351_v0 = vsel %vm1241_vm1, %v2724_v63, 0.0 }
 0x276   : > { %v2726_v1 = vpop.eup %2725  ;;  %1352 = vadd.xlane.f32.xlu0 %v1351_v0  ;;  %v1334_v6 = vmul.f32 1.442695, %v1330_v5 }
 0x277   : > { %v1348_v2 = vsel %vm1241_vm1, %v2726_v1, 0.0 }
 0x278   : > { %1349 = vadd.xlane.f32.xlu2 %v1348_v2  ;;  %2727 = vpow2.f32 %v1334_v6 }
 0x27e   : > { %v2728_v7 = vpop.eup %2727 }
 0x27f   : > { %v1342_v8 = vsel %vm1241_vm1, %v2728_v7, 0.0 }
 0x289   : > { %1228 = vrot.lane.b32.xlu1 %v1196_v38, %s3324_s4 }
 0x28a   : > { %1234 = vrot.lane.b32.xlu0 %v1196_v38, %s3325_s29 }
 0x290   : > { %1231 = vrot.lane.b32.xlu2 %v1196_v38, %s3326_s25 }
 0x2b4   : > { %1343 = vadd.xlane.f32.xlu0 %v1342_v8 }
 0x2e3   : > { %v1347_v10 = vpop.xlane.xlu1 %1346 }
 0x2e9   : > { %v1353_v11 = vpop.xlane.xlu0 %1352 }
 0x2eb   : > { %v1350_v9 = vpop.xlane.xlu2 %1349 }
 0x2ec   : > { %2729 = vrcp.f32 %v1350_v9  ;;  %v2493_v9 = vld [vmem:[#allocation10 + $0x8] sm:$0xff] }
 0x2ed   : > { %2731 = vrcp.f32 %v1347_v10  ;;  %v2492_v10 = vld [vmem:[#allocation10] sm:$0xff] }
 0x2ee   : > { %2733 = vrcp.f32 %v1353_v11  ;;  %v2711_v11 = vld [vmem:[#allocation14] ss:$0 sm:$0xff] }
 0x2f2   : > { %v2730_v12 = vpop.eup %2729 }
 0x2f3   : > { %v1232_v13 = vpop.permute.xlu2 %1231  ;;  %v1360_v14 = vmul.f32 %v2730_v12, %v2726_v1  ;;  %v2732_v18 = vpop.eup %2731 }
 0x2f4   : > { %v1239_v15 = vpack.c.bf16 %v1232_v13, %v1232_v13  ;;  %v2734_v19 = vpop.eup %2733  ;;  %v1359_v21 = vmul.f32 %v2732_v18, %v2722_v60  ;;  %v2494_v60 = vld [vmem:[#allocation13] sm:$0xff] }
 0x2f5   : > { %v1364_v17 = vpack.c.bf16 %v1360_v14, %v1360_v14  ;;  %v1361_v24 = vmul.f32 %v2734_v19, %v2724_v63 }
 0x2f6   : > { %v1409_v16 = vsel %vm1369_vm2, %v1239_v15, 0  ;;  %v1363_v28 = vpack.c.bf16 %v1359_v21, %v1359_v21 }
 0x2f7   : > { %1418 = vmatpush.bf16.msra.mxu1 %v1409_v16  ;;  %v1365_v29 = vpack.c.bf16 %v1361_v24, %v1361_v24 }
 0x2fa   : > { %2399 = vmatmul.msk.bf16.vlgmr.msra.gmra.mxu1 %vm1241_vm1, %v1364_v17 }
 0x2fb   : > { %v1229_v20 = vpop.permute.xlu1 %1228  ;;  %1604 = vmatpush.bf16.msrb.mxu1 %v2495_v58 }
 0x2fc   : > { %v1238_v22 = vpack.c.bf16 %v1229_v20, %v1229_v20  ;;  %v1235_v23 = vpop.permute.xlu0 %1234 }
 0x2fd   : > { %v1240_v25 = vpack.c.bf16 %v1235_v23, %v1235_v23 }
 0x2fe   : > { %v1390_v26 = vsel %vm1369_vm2, %v1238_v22, 0 }
 0x2ff   : > { %v1428_v27 = vsel %vm1369_vm2, %v1240_v25, 0  ;;  %1399 = vmatpush.bf16.msra.mxu0 %v1390_v26  ;;  %1605 = vmatpush.bf16.msrb.mxu1 %v2494_v60  ;;  %v2709_v26 = vld [vmem:[%s3896_s22] ss:$0 sm:$0xff] }
 0x300   : > { %1437 = vmatpush.bf16.msra.mxu2 %v1428_v27 }
 0x302   : > { %2398 = vmatmul.msk.bf16.vlgmr.msra.gmra.mxu0 %vm1241_vm1, %v1363_v28  ;;  %v2710_v28 = vld [vmem:[%s3897_s23] ss:$0 sm:$0xff] }
 0x303   : > { %2400 = vmatmul.msk.bf16.vlgmr.msra.gmra.mxu2 %vm1241_vm1, %v1365_v29  ;;  %1567 = vmatpush.bf16.msrb.mxu0 %v2493_v9 }
 0x307   : > { %1568 = vmatpush.bf16.msrb.mxu0 %v2492_v10 }
 0x30a   : > { %2427 = vmatmul.msk.bf16.vlgmr.msrb.gmra.mxu1 %vm1116_vm0, %v1574_v62 }
 0x327   : > { %v1344_v30 = vpop.xlane.xlu0 %1343 }
 0x328   : > { %2735 = vrcp.f32 %v1344_v30 }
 0x329   : > { %2737 = vrcp.f32 %v3330_v57 }
 0x32e   : > { %v2736_v31 = vpop.eup %2735 }
 0x32f   : > { %v1358_v32 = vmul.f32 %v2736_v31, %v2728_v7  ;;  %v2738_v61 = vpop.eup %2737 }
 0x330   : > { %v1502_v63 = vmul.f32 32.0, %v2738_v61  ;;  %vm1506_vm5 = vweird.f32 %v2738_v61 }
 0x331   : > { %v1362_v33 = vpack.c.bf16 %v1358_v32, %v1358_v32 }
 0x333   : > { %2397 = vmatmul.msk.bf16.vlgmr.msrb.gmra.mxu3 %vm1241_vm1, %v1362_v33  ;;  %v2497_v33 = vld [vmem:[#allocation16 + $0x8] sm:$0xff] }
 0x334   : > { %1637 = vmatpush.bf16.msrb.mxu2 %v2497_v33 }
 0x377   : > { %v1420_v34 = vpop.f32.mrf.mxu1 }
 0x378   : > { %1448 = vrot.lane.b32.xlu2 %v1420_v34, %s3327_s30 }
 0x37f   : > { %v1401_v35 = vpop.f32.mrf.mxu0  ;;  %v1422_v36 = vpop.f32.mrf.mxu1 }
 0x380   : > { %1444 = vrot.lane.b32.xlu1 %v1401_v35, %s3328_s11  ;;  %v2496_v36 = vld [vmem:[#allocation16] sm:$0xff] }
 0x381   : > { %1638 = vmatpush.bf16.msrb.mxu2 %v2496_v36 }
 0x384   : > { %2436 = vmatmul.msk.bf16.vlgmr.msrb.gmra.mxu2 %vm1116_vm0, %v1574_v62 }
 0x386   : > { %v1439_v37 = vpop.f32.mrf.mxu2 }
 0x387   : > { %v1403_v38 = vpop.f32.mrf.mxu0  ;;  %v1607_v12 = vpop.f32.mrf.mxu1 }
 0x388   : > { %1452 = vrot.lane.b32.xlu1 %v1439_v37, %s3329_s2  ;;  %v1608_v15 = vadd.f32 %v2711_v11, %v1607_v12  ;;  %v2712_v38 = vld [vmem:[#allocation11] ss:$0 sm:$0xff] }
 0x38a   : > { %1665 = vrot.lane.b32.xlu0 %v1608_v15, %s3325_s29  ;;  %v1668_v17 = vpack.c.bf16 %v1608_v15, %v1608_v15 }
 0x38c   : > { %v1690_v18 = vsel %vm1241_vm1, %v1668_v17, 0 }
 0x38d   : > { %1699 = vmatpush.bf16.xpose.msrb.mxu3 %v1690_v18 }
 0x38e   : > { %v1441_v39 = vpop.f32.mrf.mxu2 }
 0x38f   : > { %v1609_v19 = vpop.f32.mrf.mxu1 }
 0x392   : > { %1659 = vrot.lane.b32.xlu0 %v1608_v15, %s3324_s4 }
 0x3b6   : > { %v1382_v40 = vpop.f32.mrf.mxu3 }
 0x3be   : > { %v1384_v41 = vpop.f32.mrf.mxu3 }
 0x3d2   : > { %v1449_v46 = vpop.permute.xlu2 %1448 }
 0x3f2   : > { %v1445_v44 = vpop.permute.xlu1 %1444 }
 0x3f3   : > { %v1455_v45 = vsel %vm1241_vm1, %v1382_v40, %v1445_v44 }
 0x3f4   : > { %v1457_v48 = vsel %vm1456_vm3, %v1455_v45, %v1449_v46 }
 0x3fa   : > { %v1453_v47 = vpop.permute.xlu1 %1452 }
 0x3fb   : > { %v1459_v49 = vsel %vm1458_vm4, %v1457_v48, %v1453_v47 }
 0x3fc   : > { %v1460_v50 = vpack.c.bf16 %v1459_v49, %v1459_v49  ;;  %v1666_v34 = vpop.permute.xlu0 %1665 }
 0x3fd   : > { %v1671_v35 = vpack.c.bf16 %v1666_v34, %v1666_v34 }
 0x3fe   : > { %2409 = vmatmul.msk.bf16.vlgmr.msra.gmra.mxu3 %vm1116_vm0, %v1460_v50 }
 0x3ff   : > { %v1747_v37 = vsel %vm1241_vm1, %v1671_v35, 0 }
 0x400   : > { %1756 = vmatpush.bf16.xpose.msra.mxu2 %v1747_v37 }
 0x404   : > { %v1660_v43 = vpop.permute.xlu0 %1659 }
 0x405   : > { %v1669_v45 = vpack.c.bf16 %v1660_v43, %v1660_v43 }
 0x407   : > { %v1709_v47 = vsel %vm1241_vm1, %v1669_v45, 0 }
 0x408   : > { %1718 = vmatpush.bf16.xpose.msra.mxu0 %v1709_v47 }
 0x481   : > { %v1493_v52 = vpop.f32.mrf.mxu3 }
 0x482   : > { %v1494_v53 = vadd.f32 %v2708_v51, %v1493_v52 }
 0x484   : > { %v1497_v54 = vadd.f32 %v1494_v53, %v3686_v4  ;;  %v1503_v4 = vsub.f32 1.0, %v1502_v63  ;;  %v1640_v53 = vpop.f32.mrf.mxu2 }
 0x485   : > { %v1641_v60 = vadd.f32 %v2713_v59, %v1640_v53 }
 0x486   : > { %v1498_v55 = vsel %vm1116_vm0, %v1497_v54, 0.0  ;;  %v1504_v0 = vmul.f32 %v2738_v61, %v1503_v4 }
 0x487   : > { %1499 = vadd.xlane.f32.xlu2 %v1498_v55 }
 0x488   : > { %v1505_v1 = vadd.f32 %v2738_v61, %v1504_v0 }
 0x489   : > { %v1495_v56 = vpop.f32.mrf.mxu3 }
 0x48a   : > { %v3750_v2 = vsel %vm1506_vm5, %v2738_v61, %v1505_v1  ;;  %v1682_v61 = vpack.c.bf16 %v1641_v60, %v1641_v60 }
 0x48c   : > { %v1642_v56 = vpop.f32.mrf.mxu2  ;;  %v1814_v62 = vsel %vm1369_vm2, %v1682_v61, 0 }
 0x48d   : > { %1823 = vmatpush.bf16.msra.mxu3 %v1814_v62 }
 0x4fa   : > { %v1500_v3 = vpop.xlane.xlu2 %1499 }
 0x4fb   : > { %v1508_v5 = vmul.f32 %v3750_v2, %v1500_v3 }
 0x4fd   : > { %v1509_v6 = vsub.f32 %v1497_v54, %v1508_v5 }
 0x4ff   : > { %v1510_v7 = vmul.f32 %v1509_v6, %v1509_v6 }
 0x501   : > { %v1511_v8 = vsel %vm1116_vm0, %v1510_v7, 0.0 }
 0x502   : > { %1512 = vadd.xlane.f32.xlu1 %v1511_v8 }
 0x51b   : > { %1662 = vrot.lane.b32.xlu1 %v1608_v15, %s3326_s25 }
 0x575   : > { %v1513_v13 = vpop.xlane.xlu1 %1512 }
 0x576   : > { %v1514_v14 = vmul.f32 %v1513_v13, %v3750_v2 }
 0x578   : > { %v1515_v16 = vadd.f32 1e-05, %v1514_v14 }
 0x57a   : > { %2739 = vrsqrt.f32 %v1515_v16  ;;  %vm1522_vm7 = vweird.f32 %v1515_v16 }
 0x580   : > { %v2740_v20 = vpop.eup %2739 }
 0x581   : > { %v1517_v21 = vmul.f32 %v2740_v20, %v1515_v16  ;;  %vm1523_vm6 = vweird.f32 %v2740_v20 }
 0x582   : > { %vm1524_vm8 = vmor %vm1522_vm7, %vm1523_vm6 }
 0x583   : > { %v1518_v22 = vmul.f32 %v2740_v20, %v1517_v21 }
 0x585   : > { %v1519_v23 = vmul.f32 0.5, %v1518_v22 }
 0x587   : > { %v1520_v24 = vsub.f32 1.5, %v1519_v23 }
 0x589   : > { %v1521_v25 = vmul.f32 %v2740_v20, %v1520_v24 }
 0x58b   : > { %v1525_v27 = vsel %vm1524_vm8, %v2740_v20, %v1521_v25 }
 0x58c   : > { %v1526_v29 = vmul.f32 %v1525_v27, %v1509_v6 }
 0x58d   : > { %v1663_v44 = vpop.permute.xlu1 %1662 }
 0x58e   : > { %v1531_v30 = vmul.f32 %v2709_v26, %v1526_v29  ;;  %v1670_v46 = vpack.c.bf16 %v1663_v44, %v1663_v44 }
 0x590   : > { %v3765_v31 = vadd.f32 %v2710_v28, %v1531_v30  ;;  %v1728_v48 = vsel %vm1241_vm1, %v1670_v46, 0 }
 0x591   : > { %1737 = vmatpush.bf16.xpose.msra.mxu1 %v1728_v48 }
 0x592   : > { %v1537_v32 = vpack.c.bf16 %v3765_v31, %v3765_v31 }
 0x594   : > { %2418 = vmatmul.msk.bf16.vlgmr.msrb.gmra.mxu0 %vm1116_vm0, %v1537_v32 }
 0x611   : > { %v1570_v39 = vpop.f32.mrf.mxu0 }
 0x612   : > { %v1571_v40 = vadd.f32 %v2712_v38, %v1570_v39 }
 0x614   : > { %v1654_v41 = vpack.c.bf16 %v1571_v40, %v1571_v40  ;;  %1645 = vrot.lane.b32.xlu0 %v1571_v40, %s3324_s4  ;;  %1651 = vrot.lane.b32.xlu2 %v1571_v40, %s3325_s29 }
 0x616   : > { %2437 = vmatmul.msk.bf16.vlgmr.msrb.gmra.mxu3 %vm1241_vm1, %v1654_v41 }
 0x619   : > { %v1572_v42 = vpop.f32.mrf.mxu0 }
 0x61c   : > { %1648 = vrot.lane.b32.xlu0 %v1571_v40, %s3326_s25 }
 0x66e   : > { %v1652_v49 = vpop.permute.xlu2 %1651 }
 0x66f   : > { %v1657_v50 = vpack.c.bf16 %v1652_v49, %v1652_v49 }
 0x671   : > { %2440 = vmatmul.msk.bf16.vlgmr.msra.gmra.mxu2 %vm1241_vm1, %v1657_v50 }
 0x686   : > { %v1646_v51 = vpop.permute.xlu0 %1645 }
 0x687   : > { %v1655_v52 = vpack.c.bf16 %v1646_v51, %v1646_v51 }
 0x689   : > { %2438 = vmatmul.msk.bf16.vlgmr.msra.gmra.mxu0 %vm1241_vm1, %v1655_v52 }
 0x68e   : > { %v1649_v54 = vpop.permute.xlu0 %1648 }
 0x68f   : > { %v1656_v55 = vpack.c.bf16 %v1649_v54, %v1649_v54 }
 0x691   : > { %2439 = vmatmul.msk.bf16.vlgmr.msra.gmra.mxu1 %vm1241_vm1, %v1656_v55 }
 0x699   : > { %v1701_v57 = vpop.f32.mrf.mxu3 }
 0x69a   : > { %v1762_v1 = vsel %vm1241_vm1, %v1701_v57, -inf }
 0x6a1   : > { %v1703_v58 = vpop.f32.mrf.mxu3 }
 0x6f4   : > { %v1758_v63 = vpop.f32.mrf.mxu2 }
 0x6f5   : > { %v1771_v4 = vsel %vm1241_vm1, %v1758_v63, -inf }
 0x6f6   : > { %1772 = vmax.xlane.f32.xlu2 %v1771_v4  ;;  %v2499_v4 = vld [vmem:[#allocation19 + $0x8] sm:$0xff] }
 0x6f7   : > { %1931 = vmatpush.bf16.msrb.mxu3 %v2499_v4 }
 0x6fc   : > { %v1760_v0 = vpop.f32.mrf.mxu2 }
 0x6fd   : > { %v2498_v0 = vld [vmem:[#allocation19] sm:$0xff] }
 0x6fe   : > { %1763 = vmax.xlane.f32.xlu2 %v1762_v1  ;;  %1932 = vmatpush.bf16.msrb.mxu3 %v2498_v0 }
 0x706   : > { %v1720_v3 = vpop.f32.mrf.mxu0 }
 0x707   : > { %v1765_v5 = vsel %vm1241_vm1, %v1720_v3, -inf }
 0x708   : > { %1766 = vmax.xlane.f32.xlu0 %v1765_v5 }
 0x70e   : > { %v1722_v6 = vpop.f32.mrf.mxu0  ;;  %v1739_v7 = vpop.f32.mrf.mxu1 }
 0x70f   : > { %v1768_v8 = vsel %vm1241_vm1, %v1739_v7, -inf }
 0x710   : > { %1769 = vmax.xlane.f32.xlu1 %v1768_v8 }
 0x716   : > { %v1741_v9 = vpop.f32.mrf.mxu1 }
 0x769   : > { %v1773_v10 = vpop.xlane.xlu2 %1772 }
 0x76a   : > { %v1777_v11 = vsub.f32 %v1758_v63, %v1773_v10  ;;  %v2714_v10 = vld [vmem:[#allocation20] ss:$0 sm:$0xff] }
 0x76c   : > { %v1784_v12 = vmul.f32 1.442695, %v1777_v11 }
 0x76e   : > { %2741 = vpow2.f32 %v1784_v12 }
 0x771   : > { %v1764_v25 = vpop.xlane.xlu2 %1763 }
 0x772   : > { %v1774_v26 = vsub.f32 %v1701_v57, %v1764_v25  ;;  %v2504_v25 = vld [vmem:[%s3894_s20 + $0x10] sm:$0xff] }
 0x774   : > { %v2742_v13 = vpop.eup %2741  ;;  %v1778_v27 = vmul.f32 1.442695, %v1774_v26 }
 0x775   : > { %v1795_v14 = vsel %vm1241_vm1, %v2742_v13, 0.0 }
 0x776   : > { %1796 = vadd.xlane.f32.xlu0 %v1795_v14 }
 0x77b   : > { %v1767_v15 = vpop.xlane.xlu0 %1766 }
 0x77c   : > { %v1775_v16 = vsub.f32 %v1720_v3, %v1767_v15 }
 0x77e   : > { %v1780_v17 = vmul.f32 1.442695, %v1775_v16 }
 0x780   : > { %2743 = vpow2.f32 %v1780_v17 }
 0x783   : > { %v1770_v18 = vpop.xlane.xlu1 %1769 }
 0x784   : > { %v1776_v19 = vsub.f32 %v1739_v7, %v1770_v18 }
 0x786   : > { %v2744_v20 = vpop.eup %2743  ;;  %v1782_v21 = vmul.f32 1.442695, %v1776_v19 }
 0x787   : > { %v1789_v22 = vsel %vm1241_vm1, %v2744_v20, 0.0 }
 0x788   : > { %2745 = vpow2.f32 %v1782_v21  ;;  %1790 = vadd.xlane.f32.xlu1 %v1789_v22  ;;  %v2501_v21 = vld [vmem:[#allocation22 + $0x8] sm:$0xff]  ;;  %v2500_v22 = vld [vmem:[#allocation22] sm:$0xff] }
 0x789   : > { %2747 = vpow2.f32 %v1778_v27 }
 0x78a   : > { %1679 = vrot.lane.b32.xlu0 %v1641_v60, %s3325_s29 }
 0x78e   : > { %v2746_v23 = vpop.eup %2745 }
 0x78f   : > { %v1792_v24 = vsel %vm1241_vm1, %v2746_v23, 0.0  ;;  %v2748_v28 = vpop.eup %2747 }
 0x790   : > { %1793 = vadd.xlane.f32.xlu2 %v1792_v24  ;;  %v1786_v29 = vsel %vm1241_vm1, %v2748_v28, 0.0 }
 0x7a1   : > { %1673 = vrot.lane.b32.xlu1 %v1641_v60, %s3324_s4  ;;  %s1081_s4 = sand.u32 1, %s3962_s21  }
 0x7a2   : > { %s2363_s29 = sshll.u32 %s1081_s4, 3 }
 0x7a3   : > { %s1083_s5 = scalar_lea.vmem [#allocation26], %s2363_s29 }
 0x7a4   : > { %s2110_s7 = sshll.u32 %s1083_s5, 4  ;;  %s2111_s7 = int_to_ptr.vmem [resolvable:$true] %s2110_s7 }
 0x7a8   : > { %1676 = vrot.lane.b32.xlu2 %v1641_v60, %s3326_s25  ;;  %s2481_s25 = sshll.u32 %s3497_s3, 3  ;;  %s2098_s3 = scalar_lea.sflag [#allocation4], %s1081_s4 }
 0x7b4   : > { %1787 = vadd.xlane.f32.xlu0 %v1786_v29 }
 0x7e9   : > { %v1797_v30 = vpop.xlane.xlu0 %1796 }
 0x7ea   : > { %2749 = vrcp.f32 %v1797_v30 }
 0x7f0   : > { %v2750_v32 = vpop.eup %2749 }
 0x7f1   : > { %v1805_v34 = vmul.f32 %v2750_v32, %v2742_v13 }
 0x7f3   : > { %v1809_v37 = vpack.c.bf16 %v1805_v34, %v1805_v34  ;;  %v2715_v34 = vld [vmem:[%s3898_s24] ss:$0 sm:$0xff] }
 0x7fb   : > { %v1791_v39 = vpop.xlane.xlu1 %1790 }
 0x7fc   : > { %v1680_v33 = vpop.permute.xlu0 %1679 }
 0x7fd   : > { %v1685_v35 = vpack.c.bf16 %v1680_v33, %v1680_v33 }
 0x7ff   : > { %v1871_v36 = vsel %vm1369_vm2, %v1685_v35, 0 }
 0x800   : > { %1880 = vmatpush.bf16.msrb.mxu2 %v1871_v36 }
 0x803   : > { %2444 = vmatmul.msk.bf16.vlgmr.msrb.gmra.mxu2 %vm1241_vm1, %v1809_v37  ;;  %v1794_v38 = vpop.xlane.xlu2 %1793 }
 0x804   : > { %2751 = vrcp.f32 %v1794_v38 }
 0x805   : > { %2753 = vrcp.f32 %v1791_v39 }
 0x80a   : > { %v2752_v40 = vpop.eup %2751 }
 0x80b   : > { %v1677_v41 = vpop.permute.xlu2 %1676  ;;  %v1804_v42 = vmul.f32 %v2752_v40, %v2746_v23  ;;  %v2754_v46 = vpop.eup %2753 }
 0x80c   : > { %v1684_v43 = vpack.c.bf16 %v1677_v41, %v1677_v41  ;;  %v1803_v48 = vmul.f32 %v2754_v46, %v2744_v20  ;;  %v2503_v41 = vld [vmem:[%s3894_s20 + $0x8] sm:$0xff] }
 0x80d   : > { %v1808_v45 = vpack.c.bf16 %v1804_v42, %v1804_v42  ;;  %v2502_v42 = vld [vmem:[%s3894_s20] sm:$0xff] }
 0x80e   : > { %v1852_v44 = vsel %vm1369_vm2, %v1684_v43, 0  ;;  %v1807_v51 = vpack.c.bf16 %v1803_v48, %v1803_v48  ;;  %v2717_v43 = vld [vmem:[#allocation23] ss:$0 sm:$0xff] }
 0x80f   : > { %1861 = vmatpush.bf16.msrb.mxu1 %v1852_v44 }
 0x812   : > { %2443 = vmatmul.msk.bf16.vlgmr.msrb.gmra.mxu1 %vm1241_vm1, %v1808_v45 }
 0x813   : > { %v1674_v47 = vpop.permute.xlu1 %1673 }
 0x814   : > { %v1683_v49 = vpack.c.bf16 %v1674_v47, %v1674_v47 }
 0x816   : > { %v1833_v50 = vsel %vm1369_vm2, %v1683_v49, 0  ;;  %v2718_v49 = vld [vmem:[%s3961_s9] ss:$0 sm:$0xff] }
 0x817   : > { %1842 = vmatpush.bf16.msrb.mxu0 %v1833_v50 }
 0x81a   : > { %2442 = vmatmul.msk.bf16.vlgmr.msrb.gmra.mxu0 %vm1241_vm1, %v1807_v51 }
 0x81b   : > { %2001 = vmatpush.bf16.msra.mxu0 %v2501_v21 }
 0x81f   : > { %2002 = vmatpush.bf16.msra.mxu0 %v2500_v22 }
 0x827   : > { %v1788_v52 = vpop.xlane.xlu0 %1787 }
 0x828   : > { %2755 = vrcp.f32 %v1788_v52 }
 0x82e   : > { %v2756_v53 = vpop.eup %2755 }
 0x82f   : > { %v1802_v54 = vmul.f32 %v2756_v53, %v2748_v28 }
 0x831   : > { %v1806_v55 = vpack.c.bf16 %v1802_v54, %v1802_v54 }
 0x833   : > { %2441 = vmatmul.msk.bf16.vlgmr.msra.gmra.mxu3 %vm1241_vm1, %v1806_v55 }
 0x886   : > { %v1882_v56 = vpop.f32.mrf.mxu2 }
 0x88e   : > { %v1884_v57 = vpop.f32.mrf.mxu2 }
 0x88f   : > { %v1863_v58 = vpop.f32.mrf.mxu1 }
 0x890   : > { %1891 = vrot.lane.b32.xlu2 %v1863_v58, %s3327_s30  ;;  %s2108_s30 = scalar_lea.hbm %s3963_s8, %s2481_s25 }
 0x891   : > { %s2112_s12 = sshll.u32 %s2108_s30, 4  ;;  %s2113_s12 = int_to_ptr.hbm [resolvable:$true] %s2112_s12 }
 0x892   : > { %s3225_s9 = sshra.s32 %s2113_s12, 4  ;;  %s3226_s9 = int_to_ptr.hbm [resolvable:$true] %s3225_s9 }
 0x893   : > { %s3227_s21 = scalar_lea.hbm %s3226_s9, 8 }
 0x894   : > { %p3228_p0 = scmp.ne.s32.totalorder %s3226_s9, %s3227_s21 }
 0x896   : > { %p3229_p1 = pnand %p3228_p0, %p3514_p5 }
 0x897   : > { %v1844_v59 = vpop.f32.mrf.mxu0  ;;  %v1865_v60 = vpop.f32.mrf.mxu1 }
 0x898   : > { %1887 = vrot.lane.b32.xlu1 %v1844_v59, %s3328_s11  ;;  %s3964_s11 = smov %s3963_s8  ;;  %p3230_p2 = pneg %p3229_p1 }
 0x899   : > { %s3231_s29 = scalar_lea.hbm %s3964_s11, 16  ;;  %p3232_p3 = scmp.lt.s32.totalorder %s3226_s9, %s3964_s11 }
 0x89a   : > { %p3233_p4 = scmp.lt.s32.totalorder %s3231_s29, %s3227_s21 }
 0x89c   : > { %p3234_p7 = por %p3233_p4, %p3232_p3 }
 0x89e   : > { %p3235_p8 = pnand %p3234_p7, %p3230_p2 }
 0x89f   : > { %v1846_v61 = vpop.f32.mrf.mxu0 }
 0x8a0   : > { %1895 = vrot.lane.b32.xlu1 %v1882_v56, %s3329_s2  ;;  %s3960_s2 = sld [smem:[#allocation58_spill]] }
 0x8a6   : > { %v2716_v36 = vld [vmem:[%s3960_s2] ss:$0 sm:$0xff] }
 0x8b6   : > { %v1825_v62 = vpop.f32.mrf.mxu3 }
 0x8be   : > { %v1827_v63 = vpop.f32.mrf.mxu3 }
 0x8ea   : > { %v1892_v5 = vpop.permute.xlu2 %1891 }
 0x90a   : > { %v1888_v1 = vpop.permute.xlu1 %1887 }
 0x90b   : > { %v1898_v3 = vsel %vm1241_vm1, %v1825_v62, %v1888_v1 }
 0x90c   : > { %v1899_v7 = vsel %vm1456_vm3, %v1898_v3, %v1892_v5 }
 0x912   : > { %v1896_v6 = vpop.permute.xlu1 %1895 }
 0x913   : > { %v1900_v8 = vsel %vm1458_vm4, %v1899_v7, %v1896_v6  ;;  %v2719_v6 = vld [vmem:[#allocation25] ss:$0 sm:$0xff] }
 0x914   : > { %v1901_v9 = vpack.c.bf16 %v1900_v8, %v1900_v8  ;;  %v2720_v8 = vld [vmem:[%s3966_s10] ss:$0 sm:$0xff] }
 0x916   : > { %2453 = vmatmul.msk.bf16.vlgmr.msrb.gmra.mxu3 %vm1116_vm0, %v1901_v9 }
 0x999   : > { %v1934_v11 = vpop.f32.mrf.mxu3 }
 0x99a   : > { %v1935_v12 = vadd.f32 %v2714_v10, %v1934_v11 }
 0x99c   : > { %v1938_v13 = vadd.f32 %v1935_v12, %v3765_v31  ;;  %v2505_v31 = vld [vmem:[%s3894_s20 + $0x18] sm:$0xff] }
 0x99d   : > { %2054 = vmatpush.bf16.msra.mxu1 %v2505_v31 }
 0x99e   : > { %v1939_v14 = vsel %vm1116_vm0, %v1938_v13, 0.0 }
 0x99f   : > { %1940 = vadd.xlane.f32.xlu2 %v1939_v14 }
 0x9a1   : > { %v1936_v15 = vpop.f32.mrf.mxu3  ;;  %2055 = vmatpush.bf16.msra.mxu1 %v2504_v25 }
 0x9a5   : > { %2056 = vmatpush.bf16.msra.mxu1 %v2503_v41 }
 0x9a9   : > { %2057 = vmatpush.bf16.msra.mxu1 %v2502_v42 }
 0xa12   : > { %v1941_v16 = vpop.xlane.xlu2 %1940 }
 0xa13   : > { %v1942_v17 = vmul.f32 %v1941_v16, %v3750_v2 }
 0xa15   : > { %v1943_v18 = vsub.f32 %v1938_v13, %v1942_v17 }
 0xa17   : > { %v1944_v19 = vmul.f32 %v1943_v18, %v1943_v18 }
 0xa19   : > { %v1945_v20 = vsel %vm1116_vm0, %v1944_v19, 0.0 }
 0xa1a   : > { %1946 = vadd.xlane.f32.xlu1 %v1945_v20 }
 0xa8d   : > { %v1947_v23 = vpop.xlane.xlu1 %1946 }
 0xa8e   : > { %v1948_v24 = vmul.f32 %v1947_v23, %v3750_v2 }
 0xa90   : > { %v1949_v26 = vadd.f32 1e-05, %v1948_v24 }
 0xa92   : > { %2757 = vrsqrt.f32 %v1949_v26  ;;  %vm1956_vm10 = vweird.f32 %v1949_v26 }
 0xa98   : > { %v2758_v27 = vpop.eup %2757 }
 0xa99   : > { %v1951_v28 = vmul.f32 %v2758_v27, %v1949_v26  ;;  %vm1957_vm9 = vweird.f32 %v2758_v27 }
 0xa9a   : > { %vm1958_vm11 = vmor %vm1956_vm10, %vm1957_vm9 }
 0xa9b   : > { %v1952_v29 = vmul.f32 %v2758_v27, %v1951_v28 }
 0xa9d   : > { %v1953_v30 = vmul.f32 0.5, %v1952_v29 }
 0xa9f   : > { %v1954_v32 = vsub.f32 1.5, %v1953_v30 }
 0xaa1   : > { %v1955_v33 = vmul.f32 %v2758_v27, %v1954_v32 }
 0xaa3   : > { %v1959_v35 = vsel %vm1958_vm11, %v2758_v27, %v1955_v33 }
 0xaa4   : > { %v1960_v37 = vmul.f32 %v1959_v35, %v1943_v18 }
 0xaa6   : > { %v1965_v38 = vmul.f32 %v2715_v34, %v1960_v37 }
 0xaa8   : > { %v1970_v39 = vadd.f32 %v2716_v36, %v1965_v38 }
 0xaaa   : > { %v1971_v40 = vpack.c.bf16 %v1970_v39, %v1970_v39 }
 0xaac   : > { %2462 = vmatmul.msk.bf16.vlgmr.msra.gmra.mxu0 %vm1116_vm0, %v1971_v40 }
 0xb29   : > { %v2004_v44 = vpop.f32.mrf.mxu0 }
 0xb2a   : > { %v2005_v45 = vadd.f32 %v2717_v43, %v2004_v44 }
 0xb2c   : > { %v2008_v46 = vmax.f32 %v2005_v45, 0.0 }
 0xb2e   : > { %v2009_v47 = vpack.c.bf16 %v2008_v46, %v2008_v46 }
 0xb30   : > { %2479 = vmatmul.msk.bf16.vlgmr.msra.gmra.mxu1 %vm2046_vm12, %v2009_v47 }
 0xb31   : > { %v2006_v48 = vpop.f32.mrf.mxu0 }
 0xbad   : > { %v2059_v50 = vpop.f32.mrf.mxu1 }
 0xbae   : > { %v2060_v51 = vadd.f32 %v2718_v49, %v2059_v50 }
 0xbb0   : > { %v2063_v52 = vadd.f32 %v2060_v51, %v1970_v39 }
 0xbb2   : > { %v2064_v53 = vsel %vm1116_vm0, %v2063_v52, 0.0 }
 0xbb3   : > { %2065 = vadd.xlane.f32.xlu0 %v2064_v53 }
 0xbb5   : > { %v2061_v54 = vpop.f32.mrf.mxu1 }
 0xc26   : > { %v2066_v55 = vpop.xlane.xlu0 %2065 }
 0xc27   : > { %v2067_v56 = vmul.f32 %v2066_v55, %v3750_v2 }
 0xc29   : > { %v2068_v57 = vsub.f32 %v2063_v52, %v2067_v56 }
 0xc2b   : > { %v2069_v58 = vmul.f32 %v2068_v57, %v2068_v57 }
 0xc2d   : > { %v2070_v59 = vsel %vm1116_vm0, %v2069_v58, 0.0 }
 0xc2e   : > { %2071 = vadd.xlane.f32.xlu0 %v2070_v59 }
 0xca1   : > { %v2072_v60 = vpop.xlane.xlu0 %2071 }
 0xca2   : > { %v2073_v61 = vmul.f32 %v2072_v60, %v3750_v2 }
 0xca4   : > { %v2074_v62 = vadd.f32 1e-05, %v2073_v61 }
 0xca6   : > { %2759 = vrsqrt.f32 %v2074_v62  ;;  %vm2081_vm14 = vweird.f32 %v2074_v62 }
 0xcac   : > { %v2760_v63 = vpop.eup %2759 }
 0xcad   : > { %v2076_v4 = vmul.f32 %v2760_v63, %v2074_v62  ;;  %vm2082_vm13 = vweird.f32 %v2760_v63 }
 0xcae   : > { %vm2083_vm15 = vmor %vm2081_vm14, %vm2082_vm13 }
 0xcaf   : > { %v2077_v0 = vmul.f32 %v2760_v63, %v2076_v4 }
 0xcb1   : > { %v2078_v1 = vmul.f32 0.5, %v2077_v0 }
 0xcb3   : > { %v2079_v3 = vsub.f32 1.5, %v2078_v1 }
 0xcb5   : > { %v2080_v5 = vmul.f32 %v2760_v63, %v2079_v3 }
 0xcb7   : > { %v2084_v2 = vsel %vm2083_vm15, %v2760_v63, %v2080_v5 }
 0xcb8   : > { %v2085_v7 = vmul.f32 %v2084_v2, %v2068_v57 }
 0xcba   : > { %v2090_v9 = vmul.f32 %v2719_v6, %v2085_v7 }
 0xcbc   : > { %v2095_v10 = vadd.f32 %v2720_v8, %v2090_v9 }
 0xcbe   : > { %2096 = vst.msk [vmem:[%s1083_s5] sm:$0xff] %vm1116_vm0, %v2095_v10 }
 0xcbf   : > { %3238 = shalt.err (!%p3235_p8)
}
 0xcc0   : > { %2566 = dma.vmem_to_hbm [thread:$0]  (%p3514_p5), %s2111_s7, 128, %s2113_s12, %s2098_s3  }
 0xcc1 PF: > { %s3967_s4 = sld [smem:[#allocation39_spill]] }
 0xcc2   : > { %s3968_s30 = sld [smem:[#allocation36_spill]] }
 0xcc7   : > { %p2648_p9 = scmp.ge.s32.totalorder %s3967_s4, 2 }
 0xcc8   : > { %s2124_s1 = sand.u32 1, %s3968_s30  }
 0xcc9   : > { %p2615_p10 = pnand %p2648_p9, %p3518_p6  ;;  %s2125_s10 = scalar_lea.sflag [#allocation4], %s2124_s1 }
 0xccb   : > { %p2616_p11 = pneg %p2615_p10 }
 0xccd   : > { %3288 = dma.done.wait (%p2616_p11), %s2125_s10, 128  }
 0xcce   : > { %3290 = vsyncadd (%p2616_p11), %s2125_s10, 4294967168  ;;  %s3970_s30 = sld [smem:[#allocation40_spill]] }
 0xccf   : > { %s3971_s8 = sld [smem:[#allocation37_spill]] }
 0xcd0   : > { %s3972_s5 = sld [smem:[#allocation38_spill]] }
 0xcd1   : > { %s3973_s9 = sld [smem:[#allocation41_spill]] }
 0xcd4   : > { %p46_p12 = scmp.ge.s32.totalorder %s3970_s30, 4  }
 0xcd6   :  { %48 = sbr.rel (!%p46_p12) target bundleno = 29 (0x1d), region = 231 }
 0xcdb   :  { %2131 = vsyncpa [#allocation3], 1 }
 0xcdc   :  { %2133 = vsyncpa [#allocation3 + $0x1], 1 }
 0xcdd   :  { %2134 = vsyncpa [#allocation6], 1 }
 0xcde   :  { %2135 = vsyncpa [#allocation9], 1 }
 0xcdf   :  { %2136 = vsyncpa [#allocation12], 1 }
 0xce0   :  { %2137 = vsyncpa [#allocation15], 1 }
 0xce1   :  { %2138 = vsyncpa [#allocation18], 1 }
 0xce2   :  { %2139 = vsyncpa [#allocation21], 1 }
 0xce3   :  { %2140 = vsyncpa [#allocation24], 1 }
 0xce4   :  { %2141 = vsyncpa [#allocation4], 1 }
 0xce5   :  { %2143 = vsyncpa [#allocation4 + $0x1], 1 }

</bundles_post_ra>
